<compile_context>
chip_gen: v7x
topology: tpu7x:2x2x1
jax: 0.10.0
libtpu: 0.0.40
codegen_flags: <defaults>
</compile_context>

<pallas_src>
import functools

import numpy as np
import jax
import jax.numpy as jnp
from jax.experimental import pallas as pl
from jax.experimental.pallas import tpu as pltpu


def _autopilot_kernel(x_ref, hi_ref, bucket_ref, o_ref, s_ref, *,
                      num_buckets, half_life, j_pct, mean_cpu, min_cpu):
    """One block of Nb time series.

    x_ref:      (Nb, R, W)  window samples; R on sublanes, window index W on lanes
    hi_ref:     (1, B)      bucket upper edges (last real edge made right-inclusive)
    bucket_ref: (1, B)      bucket values (padded lanes hold a huge sentinel)
    o_ref:      (Nb, 1, W)  per-window recommendations
    s_ref:      (Nb, B)     VMEM scratch: decayed cumulative histogram (CDF over buckets)
    """
    nb, _, w = x_ref.shape
    b = hi_ref.shape[1]

    big = jnp.float32(3.0e38)                       # finite sentinel (> every edge / bucket)
    alpha = jnp.float32(2.0 ** (-1.0 / half_life))  # per-window half-life decay factor
    pct = jnp.float32(j_pct / 100.0)
    min_cpu_f = jnp.float32(min_cpu)
    mean_cpu_f = jnp.float32(mean_cpu)

    # Hoisted loads / reshapes (grid- and window-invariant).
    hi = hi_ref[...].reshape(1, 1, b)       # (1, 1, B)
    buckets = bucket_ref[...]               # (1, B)

    # W = ceil(T / resolution) is small and static here; one window's (Nb, R, B)
    # compare slab is live at a time (compare -> cast -> sum stays fused, no slab in VMEM).
    # TODO(synk): for production-sized W promote the window axis to a trailing
    # "arbitrary" grid axis (pl.when(t == 0) init of s_ref) instead of unrolling.
    for t in range(w):
        # (Nb, R, 1): R is already on sublanes, so broadcasting against the B bucket
        # edges is a single-lane -> all-lanes broadcast (no per-window relayout).
        x_t = x_ref[:, :, t:t + 1]
        xm = jnp.where(x_t >= min_cpu_f, x_t, big)        # drop below-range + -inf padding
        lt = (xm < hi).astype(jnp.float32)                 # (Nb, R, B) lane-dense in B
        cdf = jnp.sum(lt, axis=1)                          # (Nb, B) per-window cumulative hist

        # Exponential half-life recurrence; state lives in VMEM scratch, not in vregs
        # carried across the unrolled loop.
        if t == 0:
            s = cdf
        else:
            s = alpha * s_ref[...] + cdf
        s_ref[...] = s

        # Decayed in-range sample count == last real CDF lane (CDF is monotone), so no
        # 512-lane max reduce and no dependence on the padded-hi-lane fill value.
        total = s[:, num_buckets - 1:num_buckets]          # (Nb, 1)
        cond = s >= pct * total                            # (Nb, B) percentile reached?
        rec = jnp.min(jnp.where(cond, buckets, big), axis=1, keepdims=True)  # first bucket
        # TODO(synk): mean_cpu fallback for an empty decayed histogram mirrors the numpy
        # reference; exact get_granular_rec handling of this edge is not in the source.
        rec = jnp.where(total > 0.0, rec, mean_cpu_f)      # (Nb, 1)

        # Direct static-column write (replaces the iota + select chain).
        o_ref[:, 0:1, t:t + 1] = rec[:, :, None]


def autopilot_predict(series, *, min_cpu, max_cpu, mean_cpu,
                      num_buckets=400, resolution=20, half_life=12, j_pct=95,
                      block_n_max=64):
    """series: (N, T) float32. Returns (N, T) per-timestep CPU recommendations."""
    series = jnp.asarray(series, jnp.float32)
    n, t = series.shape
    w = -(-t // resolution)                  # number of aggregation windows
    t_pad = w * resolution

    # Batch block: big enough to amortize the ~0.35 us/step pipeline overhead; only
    # rounded down when N is small enough that fewer than 2 grid steps would result
    # (keeps both v7x TensorCores busy). VMEM stays far under the 32 MiB scoped limit
    # on every generation (including v7x's 64 MiB physical).
    nb = min(int(block_n_max), max(1, -(-n // 2)))
    n_pad = -(-n // nb) * nb

    # -inf padding: excluded from every bucket regardless of |min_cpu| magnitude.
    x = jnp.pad(series, ((0, n_pad - n), (0, t_pad - t)),
                constant_values=float("-inf"))
    # (N, R, W): window samples on sublanes, window index on lanes.
    x = jnp.swapaxes(x.reshape(n_pad, w, resolution), 1, 2)

    # Bin / bucket construction exactly as in the module __init__ (incl. the abs() quirk).
    bucket_size = (max_cpu - abs(min_cpu)) / num_buckets
    cpu_buckets = np.linspace(min_cpu + bucket_size, max_cpu, num=num_buckets)
    cpu_bins = np.linspace(min_cpu, max_cpu, num=num_buckets + 1)
    hi_np = cpu_bins[1:].astype(np.float32)
    # np.histogram makes the LAST bin's right edge inclusive; do the nextafter in
    # float32 so the bump survives the cast.
    hi_np[-1] = np.nextafter(np.float32(max_cpu), np.float32(np.inf))

    b_pad = ((num_buckets + 127) // 128) * 128           # 400 -> 512: lane-dense vregs
    sentinel = np.float32(3.0e38)
    hi_full = np.full((1, b_pad), hi_np[-1], np.float32)       # dummy edges = last real edge
    hi_full[0, :num_buckets] = hi_np
    buckets_full = np.full((1, b_pad), sentinel, np.float32)   # dummy buckets never win the min
    buckets_full[0, :num_buckets] = cpu_buckets.astype(np.float32)

    kernel = functools.partial(_autopilot_kernel,
                               num_buckets=int(num_buckets),
                               half_life=float(half_life),
                               j_pct=float(j_pct),
                               mean_cpu=float(mean_cpu),
                               min_cpu=float(min_cpu))

    recs = pl.pallas_call(
        kernel,
        out_shape=jax.ShapeDtypeStruct((n_pad, 1, w), jnp.float32),
        grid=(n_pad // nb,),
        in_specs=[
            pl.BlockSpec((nb, resolution, w), lambda i: (i, 0, 0)),   # this block's series
            pl.BlockSpec((1, b_pad), lambda i: (0, 0)),               # bucket upper edges (resident)
            pl.BlockSpec((1, b_pad), lambda i: (0, 0)),               # bucket values      (resident)
        ],
        out_specs=pl.BlockSpec((nb, 1, w), lambda i: (i, 0, 0)),      # per-window recs
        scratch_shapes=[pltpu.VMEM((nb, b_pad), jnp.float32)],        # decayed CDF state
        compiler_params=pltpu.CompilerParams(
            dimension_semantics=("parallel",),
            vmem_limit_bytes=32 * 1024 * 1024),
    )(x, jnp.asarray(hi_full), jnp.asarray(buckets_full))

    # Granular expansion (one rec per raw timestep) done lane-dense outside the kernel.
    recs = recs[:n, 0, :]                                   # (N, W)
    return jnp.repeat(recs, resolution, axis=1)[:, :t]      # (N, T)


def reference_predict(series, *, min_cpu, max_cpu, mean_cpu,
                      num_buckets=400, resolution=20, half_life=12, j_pct=95):
    """Pure numpy reference mirroring the Autopilot percentile recommender."""
    series = np.asarray(series, np.float64)
    bucket_size = (max_cpu - abs(min_cpu)) / num_buckets
    cpu_buckets = np.linspace(min_cpu + bucket_size, max_cpu, num=num_buckets)
    cpu_bins = np.linspace(min_cpu, max_cpu, num=num_buckets + 1)
    outs = []
    for ts in series:
        t = ts.shape[0]
        w = -(-t // resolution)
        pad = np.full(w * resolution - t, min_cpu - 1.0)
        x = np.concatenate([ts, pad]).reshape(w, resolution)
        hist = np.stack([np.histogram(row, bins=cpu_bins)[0] for row in x]).astype(np.float64)
        recs = np.empty(w)
        for i in range(w):
            wts = 2.0 ** (-(i - np.arange(i + 1)) / half_life)
            wh = (wts[:, None] * hist[:i + 1]).sum(0)
            total = wh.sum()
            if total <= 0:
                recs[i] = mean_cpu
            else:
                cum = np.cumsum(wh)
                idx = int(np.argmax(cum >= (j_pct / 100.0) * total))
                recs[i] = cpu_buckets[idx]
        outs.append(np.repeat(recs, resolution)[:t])
    return np.stack(outs)


if __name__ == "__main__":
    key = jax.random.PRNGKey(0)
    n, t = 2, 150                          # 2 time series, 150 timesteps each
    min_cpu, max_cpu, mean_cpu = 0.0, 1.0, 0.35
    series = jax.random.uniform(key, (n, t), jnp.float32, minval=min_cpu, maxval=max_cpu)

    out = autopilot_predict(series, min_cpu=min_cpu, max_cpu=max_cpu, mean_cpu=mean_cpu)
    out = jax.block_until_ready(out)
    assert out.shape == (n, t)

    ref = reference_predict(np.asarray(series), min_cpu=min_cpu, max_cpu=max_cpu,
                            mean_cpu=mean_cpu)
    # generous tolerance: fp differences at a percentile boundary shift by ~1 bucket (0.0025)
    np.testing.assert_allclose(np.asarray(out), ref, atol=0.02)

    print("KERNEL_OK")
</pallas_src>

<mosaic_0001>
module attributes {stable_mosaic.version = 11 : i64} {
  func.func @_autopilot_kernel(%arg0: i32, %arg1: memref<1x20x8xf32, #tpu.memory_space<vmem>>, %arg2: memref<1x512xf32, #tpu.memory_space<vmem>>, %arg3: memref<1x512xf32, #tpu.memory_space<vmem>>, %arg4: memref<1x1x8xf32, #tpu.memory_space<vmem>>, %arg5: memref<1x512xf32, #tpu.memory_space<vmem>>) attributes {dimension_semantics = [#tpu.dimension_semantics<parallel>], iteration_bounds = array<i64: 2>, scalar_prefetch = 0 : i64, scratch_operands = 1 : i64, tpu.core_type = #tpu.core_type<tc>, window_params = [{transform_indices = @transform_0, window_bounds = array<i64: 1, 20, 8>}, {pipeline_mode = #tpu.pipeline_mode<synchronous>, transform_indices = @transform_1, window_bounds = array<i64: 1, 512>}, {pipeline_mode = #tpu.pipeline_mode<synchronous>, transform_indices = @transform_2, window_bounds = array<i64: 1, 512>}, {transform_indices = @transform_3, window_bounds = array<i64: 1, 1, 8>}]} {
    %c0 = arith.constant 0 : index
    %c0_0 = arith.constant 0 : index
    %0 = vector.load %arg2[%c0, %c0_0] : memref<1x512xf32, #tpu.memory_space<vmem>>, vector<1x512xf32>
    %1 = vector.shape_cast %0 : vector<1x512xf32> to vector<1x1x512xf32>
    %c0_1 = arith.constant 0 : index
    %c0_2 = arith.constant 0 : index
    %2 = vector.load %arg3[%c0_1, %c0_2] : memref<1x512xf32, #tpu.memory_space<vmem>>, vector<1x512xf32>
    %c0_3 = arith.constant 0 : index
    %c0_4 = arith.constant 0 : index
    %c0_5 = arith.constant 0 : index
    %3 = vector.load %arg1[%c0_3, %c0_4, %c0_5] : memref<1x20x8xf32, #tpu.memory_space<vmem>>, vector<1x20x1xf32>
    %cst = arith.constant 0.000000e+00 : f32
    %4 = vector.broadcast %cst : f32 to vector<1x20x1xf32>
    %5 = arith.cmpf oge, %3, %4 : vector<1x20x1xf32>
    %cst_6 = arith.constant 3.000000e+38 : f32
    %6 = vector.broadcast %cst_6 : f32 to vector<1x20x1xf32>
    %7 = arith.select %5, %3, %6 : vector<1x20x1xi1>, vector<1x20x1xf32>
    %8 = vector.broadcast %7 : vector<1x20x1xf32> to vector<1x20x512xf32>
    %9 = vector.broadcast %1 : vector<1x1x512xf32> to vector<1x20x512xf32>
    %10 = arith.cmpf olt, %8, %9 : vector<1x20x512xf32>
    %11 = arith.extui %10 : vector<1x20x512xi1> to vector<1x20x512xi32>
    %12 = arith.sitofp %11 : vector<1x20x512xi32> to vector<1x20x512xf32>
    %cst_7 = arith.constant dense<0.000000e+00> : vector<1x512xf32>
    %13 = vector.multi_reduction <add>, %12, %cst_7 [1] : vector<1x20x512xf32> to vector<1x512xf32>
    %c0_8 = arith.constant 0 : index
    %c0_9 = arith.constant 0 : index
    %14 = vector.load %arg5[%c0_8, %c0_9] : memref<1x512xf32, #tpu.memory_space<vmem>>, vector<1x512xf32>
    tpu.vector_store %arg5[%c0_8, %c0_9], %13 {strides = array<i32>} : memref<1x512xf32, #tpu.memory_space<vmem>>, vector<1x512xf32>,
    %15 = vector.extract_strided_slice %13 {offsets = [0, 399], sizes = [1, 1], strides = [1, 1]} : vector<1x512xf32> to vector<1x1xf32>
    %cst_10 = arith.constant 0.949999988 : f32
    %16 = vector.broadcast %cst_10 : f32 to vector<1x1xf32>
    %17 = arith.mulf %16, %15 : vector<1x1xf32>
    %18 = vector.broadcast %17 : vector<1x1xf32> to vector<1x512xf32>
    %19 = arith.cmpf oge, %13, %18 : vector<1x512xf32>
    %cst_11 = arith.constant 3.000000e+38 : f32
    %20 = vector.broadcast %cst_11 : f32 to vector<1x512xf32>
    %21 = arith.select %19, %2, %20 : vector<1x512xi1>, vector<1x512xf32>
    %cst_12 = arith.constant dense<0x7F800000> : vector<1xf32>
    %22 = vector.multi_reduction <minimumf>, %21, %cst_12 [1] : vector<1x512xf32> to vector<1xf32>
    %23 = vector.shape_cast %22 : vector<1xf32> to vector<1x1xf32>
    %cst_13 = arith.constant 0.000000e+00 : f32
    %24 = vector.broadcast %cst_13 : f32 to vector<1x1xf32>
    %25 = arith.cmpf ogt, %15, %24 : vector<1x1xf32>
    %cst_14 = arith.constant 3.500000e-01 : f32
    %26 = vector.broadcast %cst_14 : f32 to vector<1x1xf32>
    %27 = arith.select %25, %23, %26 : vector<1x1xi1>, vector<1x1xf32>
    %28 = vector.shape_cast %27 : vector<1x1xf32> to vector<1x1x1xf32>
    %c0_15 = arith.constant 0 : index
    %c0_16 = arith.constant 0 : index
    %c0_17 = arith.constant 0 : index
    %29 = vector.load %arg4[%c0_15, %c0_16, %c0_17] : memref<1x1x8xf32, #tpu.memory_space<vmem>>, vector<1x1x1xf32>
    tpu.vector_store %arg4[%c0_15, %c0_16, %c0_17], %28 {strides = array<i32>} : memref<1x1x8xf32, #tpu.memory_space<vmem>>, vector<1x1x1xf32>,
    %c0_18 = arith.constant 0 : index
    %c0_19 = arith.constant 0 : index
    %c1 = arith.constant 1 : index
    %30 = vector.load %arg1[%c0_18, %c0_19, %c1] : memref<1x20x8xf32, #tpu.memory_space<vmem>>, vector<1x20x1xf32>
    %cst_20 = arith.constant 0.000000e+00 : f32
    %31 = vector.broadcast %cst_20 : f32 to vector<1x20x1xf32>
    %32 = arith.cmpf oge, %30, %31 : vector<1x20x1xf32>
    %cst_21 = arith.constant 3.000000e+38 : f32
    %33 = vector.broadcast %cst_21 : f32 to vector<1x20x1xf32>
    %34 = arith.select %32, %30, %33 : vector<1x20x1xi1>, vector<1x20x1xf32>
    %35 = vector.broadcast %34 : vector<1x20x1xf32> to vector<1x20x512xf32>
    %36 = vector.broadcast %1 : vector<1x1x512xf32> to vector<1x20x512xf32>
    %37 = arith.cmpf olt, %35, %36 : vector<1x20x512xf32>
    %38 = arith.extui %37 : vector<1x20x512xi1> to vector<1x20x512xi32>
    %39 = arith.sitofp %38 : vector<1x20x512xi32> to vector<1x20x512xf32>
    %cst_22 = arith.constant dense<0.000000e+00> : vector<1x512xf32>
    %40 = vector.multi_reduction <add>, %39, %cst_22 [1] : vector<1x20x512xf32> to vector<1x512xf32>
    %c0_23 = arith.constant 0 : index
    %c0_24 = arith.constant 0 : index
    %41 = vector.load %arg5[%c0_23, %c0_24] : memref<1x512xf32, #tpu.memory_space<vmem>>, vector<1x512xf32>
    %cst_25 = arith.constant 0.943874299 : f32
    %42 = vector.broadcast %cst_25 : f32 to vector<1x512xf32>
    %43 = arith.mulf %42, %41 : vector<1x512xf32>
    %44 = arith.addf %43, %40 : vector<1x512xf32>
    %c0_26 = arith.constant 0 : index
    %c0_27 = arith.constant 0 : index
    %45 = vector.load %arg5[%c0_26, %c0_27] : memref<1x512xf32, #tpu.memory_space<vmem>>, vector<1x512xf32>
    tpu.vector_store %arg5[%c0_26, %c0_27], %44 {strides = array<i32>} : memref<1x512xf32, #tpu.memory_space<vmem>>, vector<1x512xf32>,
    %46 = vector.extract_strided_slice %44 {offsets = [0, 399], sizes = [1, 1], strides = [1, 1]} : vector<1x512xf32> to vector<1x1xf32>
    %cst_28 = arith.constant 0.949999988 : f32
    %47 = vector.broadcast %cst_28 : f32 to vector<1x1xf32>
    %48 = arith.mulf %47, %46 : vector<1x1xf32>
    %49 = vector.broadcast %48 : vector<1x1xf32> to vector<1x512xf32>
    %50 = arith.cmpf oge, %44, %49 : vector<1x512xf32>
    %cst_29 = arith.constant 3.000000e+38 : f32
    %51 = vector.broadcast %cst_29 : f32 to vector<1x512xf32>
    %52 = arith.select %50, %2, %51 : vector<1x512xi1>, vector<1x512xf32>
    %cst_30 = arith.constant dense<0x7F800000> : vector<1xf32>
    %53 = vector.multi_reduction <minimumf>, %52, %cst_30 [1] : vector<1x512xf32> to vector<1xf32>
    %54 = vector.shape_cast %53 : vector<1xf32> to vector<1x1xf32>
    %cst_31 = arith.constant 0.000000e+00 : f32
    %55 = vector.broadcast %cst_31 : f32 to vector<1x1xf32>
    %56 = arith.cmpf ogt, %46, %55 : vector<1x1xf32>
    %cst_32 = arith.constant 3.500000e-01 : f32
    %57 = vector.broadcast %cst_32 : f32 to vector<1x1xf32>
    %58 = arith.select %56, %54, %57 : vector<1x1xi1>, vector<1x1xf32>
    %59 = vector.shape_cast %58 : vector<1x1xf32> to vector<1x1x1xf32>
    %c0_33 = arith.constant 0 : index
    %c0_34 = arith.constant 0 : index
    %c1_35 = arith.constant 1 : index
    %60 = vector.load %arg4[%c0_33, %c0_34, %c1_35] : memref<1x1x8xf32, #tpu.memory_space<vmem>>, vector<1x1x1xf32>
    tpu.vector_store %arg4[%c0_33, %c0_34, %c1_35], %59 {strides = array<i32>} : memref<1x1x8xf32, #tpu.memory_space<vmem>>, vector<1x1x1xf32>,
    %c0_36 = arith.constant 0 : index
    %c0_37 = arith.constant 0 : index
    %c2 = arith.constant 2 : index
    %61 = vector.load %arg1[%c0_36, %c0_37, %c2] : memref<1x20x8xf32, #tpu.memory_space<vmem>>, vector<1x20x1xf32>
    %cst_38 = arith.constant 0.000000e+00 : f32
    %62 = vector.broadcast %cst_38 : f32 to vector<1x20x1xf32>
    %63 = arith.cmpf oge, %61, %62 : vector<1x20x1xf32>
    %cst_39 = arith.constant 3.000000e+38 : f32
    %64 = vector.broadcast %cst_39 : f32 to vector<1x20x1xf32>
    %65 = arith.select %63, %61, %64 : vector<1x20x1xi1>, vector<1x20x1xf32>
    %66 = vector.broadcast %65 : vector<1x20x1xf32> to vector<1x20x512xf32>
    %67 = vector.broadcast %1 : vector<1x1x512xf32> to vector<1x20x512xf32>
    %68 = arith.cmpf olt, %66, %67 : vector<1x20x512xf32>
    %69 = arith.extui %68 : vector<1x20x512xi1> to vector<1x20x512xi32>
    %70 = arith.sitofp %69 : vector<1x20x512xi32> to vector<1x20x512xf32>
    %cst_40 = arith.constant dense<0.000000e+00> : vector<1x512xf32>
    %71 = vector.multi_reduction <add>, %70, %cst_40 [1] : vector<1x20x512xf32> to vector<1x512xf32>
    %c0_41 = arith.constant 0 : index
    %c0_42 = arith.constant 0 : index
    %72 = vector.load %arg5[%c0_41, %c0_42] : memref<1x512xf32, #tpu.memory_space<vmem>>, vector<1x512xf32>
    %cst_43 = arith.constant 0.943874299 : f32
    %73 = vector.broadcast %cst_43 : f32 to vector<1x512xf32>
    %74 = arith.mulf %73, %72 : vector<1x512xf32>
    %75 = arith.addf %74, %71 : vector<1x512xf32>
    %c0_44 = arith.constant 0 : index
    %c0_45 = arith.constant 0 : index
    %76 = vector.load %arg5[%c0_44, %c0_45] : memref<1x512xf32, #tpu.memory_space<vmem>>, vector<1x512xf32>
    tpu.vector_store %arg5[%c0_44, %c0_45], %75 {strides = array<i32>} : memref<1x512xf32, #tpu.memory_space<vmem>>, vector<1x512xf32>,
    %77 = vector.extract_strided_slice %75 {offsets = [0, 399], sizes = [1, 1], strides = [1, 1]} : vector<1x512xf32> to vector<1x1xf32>
    %cst_46 = arith.constant 0.949999988 : f32
    %78 = vector.broadcast %cst_46 : f32 to vector<1x1xf32>
    %79 = arith.mulf %78, %77 : vector<1x1xf32>
    %80 = vector.broadcast %79 : vector<1x1xf32> to vector<1x512xf32>
    %81 = arith.cmpf oge, %75, %80 : vector<1x512xf32>
    %cst_47 = arith.constant 3.000000e+38 : f32
    %82 = vector.broadcast %cst_47 : f32 to vector<1x512xf32>
    %83 = arith.select %81, %2, %82 : vector<1x512xi1>, vector<1x512xf32>
    %cst_48 = arith.constant dense<0x7F800000> : vector<1xf32>
    %84 = vector.multi_reduction <minimumf>, %83, %cst_48 [1] : vector<1x512xf32> to vector<1xf32>
    %85 = vector.shape_cast %84 : vector<1xf32> to vector<1x1xf32>
    %cst_49 = arith.constant 0.000000e+00 : f32
    %86 = vector.broadcast %cst_49 : f32 to vector<1x1xf32>
    %87 = arith.cmpf ogt, %77, %86 : vector<1x1xf32>
    %cst_50 = arith.constant 3.500000e-01 : f32
    %88 = vector.broadcast %cst_50 : f32 to vector<1x1xf32>
    %89 = arith.select %87, %85, %88 : vector<1x1xi1>, vector<1x1xf32>
    %90 = vector.shape_cast %89 : vector<1x1xf32> to vector<1x1x1xf32>
    %c0_51 = arith.constant 0 : index
    %c0_52 = arith.constant 0 : index
    %c2_53 = arith.constant 2 : index
    %91 = vector.load %arg4[%c0_51, %c0_52, %c2_53] : memref<1x1x8xf32, #tpu.memory_space<vmem>>, vector<1x1x1xf32>
    tpu.vector_store %arg4[%c0_51, %c0_52, %c2_53], %90 {strides = array<i32>} : memref<1x1x8xf32, #tpu.memory_space<vmem>>, vector<1x1x1xf32>,
    %c0_54 = arith.constant 0 : index
    %c0_55 = arith.constant 0 : index
    %c3 = arith.constant 3 : index
    %92 = vector.load %arg1[%c0_54, %c0_55, %c3] : memref<1x20x8xf32, #tpu.memory_space<vmem>>, vector<1x20x1xf32>
    %cst_56 = arith.constant 0.000000e+00 : f32
    %93 = vector.broadcast %cst_56 : f32 to vector<1x20x1xf32>
    %94 = arith.cmpf oge, %92, %93 : vector<1x20x1xf32>
    %cst_57 = arith.constant 3.000000e+38 : f32
    %95 = vector.broadcast %cst_57 : f32 to vector<1x20x1xf32>
    %96 = arith.select %94, %92, %95 : vector<1x20x1xi1>, vector<1x20x1xf32>
    %97 = vector.broadcast %96 : vector<1x20x1xf32> to vector<1x20x512xf32>
    %98 = vector.broadcast %1 : vector<1x1x512xf32> to vector<1x20x512xf32>
    %99 = arith.cmpf olt, %97, %98 : vector<1x20x512xf32>
    %100 = arith.extui %99 : vector<1x20x512xi1> to vector<1x20x512xi32>
    %101 = arith.sitofp %100 : vector<1x20x512xi32> to vector<1x20x512xf32>
    %cst_58 = arith.constant dense<0.000000e+00> : vector<1x512xf32>
    %102 = vector.multi_reduction <add>, %101, %cst_58 [1] : vector<1x20x512xf32> to vector<1x512xf32>
    %c0_59 = arith.constant 0 : index
    %c0_60 = arith.constant 0 : index
    %103 = vector.load %arg5[%c0_59, %c0_60] : memref<1x512xf32, #tpu.memory_space<vmem>>, vector<1x512xf32>
    %cst_61 = arith.constant 0.943874299 : f32
    %104 = vector.broadcast %cst_61 : f32 to vector<1x512xf32>
    %105 = arith.mulf %104, %103 : vector<1x512xf32>
    %106 = arith.addf %105, %102 : vector<1x512xf32>
    %c0_62 = arith.constant 0 : index
    %c0_63 = arith.constant 0 : index
    %107 = vector.load %arg5[%c0_62, %c0_63] : memref<1x512xf32, #tpu.memory_space<vmem>>, vector<1x512xf32>
    tpu.vector_store %arg5[%c0_62, %c0_63], %106 {strides = array<i32>} : memref<1x512xf32, #tpu.memory_space<vmem>>, vector<1x512xf32>,
    %108 = vector.extract_strided_slice %106 {offsets = [0, 399], sizes = [1, 1], strides = [1, 1]} : vector<1x512xf32> to vector<1x1xf32>
    %cst_64 = arith.constant 0.949999988 : f32
    %109 = vector.broadcast %cst_64 : f32 to vector<1x1xf32>
    %110 = arith.mulf %109, %108 : vector<1x1xf32>
    %111 = vector.broadcast %110 : vector<1x1xf32> to vector<1x512xf32>
    %112 = arith.cmpf oge, %106, %111 : vector<1x512xf32>
    %cst_65 = arith.constant 3.000000e+38 : f32
    %113 = vector.broadcast %cst_65 : f32 to vector<1x512xf32>
    %114 = arith.select %112, %2, %113 : vector<1x512xi1>, vector<1x512xf32>
    %cst_66 = arith.constant dense<0x7F800000> : vector<1xf32>
    %115 = vector.multi_reduction <minimumf>, %114, %cst_66 [1] : vector<1x512xf32> to vector<1xf32>
    %116 = vector.shape_cast %115 : vector<1xf32> to vector<1x1xf32>
    %cst_67 = arith.constant 0.000000e+00 : f32
    %117 = vector.broadcast %cst_67 : f32 to vector<1x1xf32>
    %118 = arith.cmpf ogt, %108, %117 : vector<1x1xf32>
    %cst_68 = arith.constant 3.500000e-01 : f32
    %119 = vector.broadcast %cst_68 : f32 to vector<1x1xf32>
    %120 = arith.select %118, %116, %119 : vector<1x1xi1>, vector<1x1xf32>
    %121 = vector.shape_cast %120 : vector<1x1xf32> to vector<1x1x1xf32>
    %c0_69 = arith.constant 0 : index
    %c0_70 = arith.constant 0 : index
    %c3_71 = arith.constant 3 : index
    %122 = vector.load %arg4[%c0_69, %c0_70, %c3_71] : memref<1x1x8xf32, #tpu.memory_space<vmem>>, vector<1x1x1xf32>
    tpu.vector_store %arg4[%c0_69, %c0_70, %c3_71], %121 {strides = array<i32>} : memref<1x1x8xf32, #tpu.memory_space<vmem>>, vector<1x1x1xf32>,
    %c0_72 = arith.constant 0 : index
    %c0_73 = arith.constant 0 : index
    %c4 = arith.constant 4 : index
    %123 = vector.load %arg1[%c0_72, %c0_73, %c4] : memref<1x20x8xf32, #tpu.memory_space<vmem>>, vector<1x20x1xf32>
    %cst_74 = arith.constant 0.000000e+00 : f32
    %124 = vector.broadcast %cst_74 : f32 to vector<1x20x1xf32>
    %125 = arith.cmpf oge, %123, %124 : vector<1x20x1xf32>
    %cst_75 = arith.constant 3.000000e+38 : f32
    %126 = vector.broadcast %cst_75 : f32 to vector<1x20x1xf32>
    %127 = arith.select %125, %123, %126 : vector<1x20x1xi1>, vector<1x20x1xf32>
    %128 = vector.broadcast %127 : vector<1x20x1xf32> to vector<1x20x512xf32>
    %129 = vector.broadcast %1 : vector<1x1x512xf32> to vector<1x20x512xf32>
    %130 = arith.cmpf olt, %128, %129 : vector<1x20x512xf32>
    %131 = arith.extui %130 : vector<1x20x512xi1> to vector<1x20x512xi32>
    %132 = arith.sitofp %131 : vector<1x20x512xi32> to vector<1x20x512xf32>
    %cst_76 = arith.constant dense<0.000000e+00> : vector<1x512xf32>
    %133 = vector.multi_reduction <add>, %132, %cst_76 [1] : vector<1x20x512xf32> to vector<1x512xf32>
    %c0_77 = arith.constant 0 : index
    %c0_78 = arith.constant 0 : index
    %134 = vector.load %arg5[%c0_77, %c0_78] : memref<1x512xf32, #tpu.memory_space<vmem>>, vector<1x512xf32>
    %cst_79 = arith.constant 0.943874299 : f32
    %135 = vector.broadcast %cst_79 : f32 to vector<1x512xf32>
    %136 = arith.mulf %135, %134 : vector<1x512xf32>
    %137 = arith.addf %136, %133 : vector<1x512xf32>
    %c0_80 = arith.constant 0 : index
    %c0_81 = arith.constant 0 : index
    %138 = vector.load %arg5[%c0_80, %c0_81] : memref<1x512xf32, #tpu.memory_space<vmem>>, vector<1x512xf32>
    tpu.vector_store %arg5[%c0_80, %c0_81], %137 {strides = array<i32>} : memref<1x512xf32, #tpu.memory_space<vmem>>, vector<1x512xf32>,
    %139 = vector.extract_strided_slice %137 {offsets = [0, 399], sizes = [1, 1], strides = [1, 1]} : vector<1x512xf32> to vector<1x1xf32>
    %cst_82 = arith.constant 0.949999988 : f32
    %140 = vector.broadcast %cst_82 : f32 to vector<1x1xf32>
    %141 = arith.mulf %140, %139 : vector<1x1xf32>
    %142 = vector.broadcast %141 : vector<1x1xf32> to vector<1x512xf32>
    %143 = arith.cmpf oge, %137, %142 : vector<1x512xf32>
    %cst_83 = arith.constant 3.000000e+38 : f32
    %144 = vector.broadcast %cst_83 : f32 to vector<1x512xf32>
    %145 = arith.select %143, %2, %144 : vector<1x512xi1>, vector<1x512xf32>
    %cst_84 = arith.constant dense<0x7F800000> : vector<1xf32>
    %146 = vector.multi_reduction <minimumf>, %145, %cst_84 [1] : vector<1x512xf32> to vector<1xf32>
    %147 = vector.shape_cast %146 : vector<1xf32> to vector<1x1xf32>
    %cst_85 = arith.constant 0.000000e+00 : f32
    %148 = vector.broadcast %cst_85 : f32 to vector<1x1xf32>
    %149 = arith.cmpf ogt, %139, %148 : vector<1x1xf32>
    %cst_86 = arith.constant 3.500000e-01 : f32
    %150 = vector.broadcast %cst_86 : f32 to vector<1x1xf32>
    %151 = arith.select %149, %147, %150 : vector<1x1xi1>, vector<1x1xf32>
    %152 = vector.shape_cast %151 : vector<1x1xf32> to vector<1x1x1xf32>
    %c0_87 = arith.constant 0 : index
    %c0_88 = arith.constant 0 : index
    %c4_89 = arith.constant 4 : index
    %153 = vector.load %arg4[%c0_87, %c0_88, %c4_89] : memref<1x1x8xf32, #tpu.memory_space<vmem>>, vector<1x1x1xf32>
    tpu.vector_store %arg4[%c0_87, %c0_88, %c4_89], %152 {strides = array<i32>} : memref<1x1x8xf32, #tpu.memory_space<vmem>>, vector<1x1x1xf32>,
    %c0_90 = arith.constant 0 : index
    %c0_91 = arith.constant 0 : index
    %c5 = arith.constant 5 : index
    %154 = vector.load %arg1[%c0_90, %c0_91, %c5] : memref<1x20x8xf32, #tpu.memory_space<vmem>>, vector<1x20x1xf32>
    %cst_92 = arith.constant 0.000000e+00 : f32
    %155 = vector.broadcast %cst_92 : f32 to vector<1x20x1xf32>
    %156 = arith.cmpf oge, %154, %155 : vector<1x20x1xf32>
    %cst_93 = arith.constant 3.000000e+38 : f32
    %157 = vector.broadcast %cst_93 : f32 to vector<1x20x1xf32>
    %158 = arith.select %156, %154, %157 : vector<1x20x1xi1>, vector<1x20x1xf32>
    %159 = vector.broadcast %158 : vector<1x20x1xf32> to vector<1x20x512xf32>
    %160 = vector.broadcast %1 : vector<1x1x512xf32> to vector<1x20x512xf32>
    %161 = arith.cmpf olt, %159, %160 : vector<1x20x512xf32>
    %162 = arith.extui %161 : vector<1x20x512xi1> to vector<1x20x512xi32>
    %163 = arith.sitofp %162 : vector<1x20x512xi32> to vector<1x20x512xf32>
    %cst_94 = arith.constant dense<0.000000e+00> : vector<1x512xf32>
    %164 = vector.multi_reduction <add>, %163, %cst_94 [1] : vector<1x20x512xf32> to vector<1x512xf32>
    %c0_95 = arith.constant 0 : index
    %c0_96 = arith.constant 0 : index
    %165 = vector.load %arg5[%c0_95, %c0_96] : memref<1x512xf32, #tpu.memory_space<vmem>>, vector<1x512xf32>
    %cst_97 = arith.constant 0.943874299 : f32
    %166 = vector.broadcast %cst_97 : f32 to vector<1x512xf32>
    %167 = arith.mulf %166, %165 : vector<1x512xf32>
    %168 = arith.addf %167, %164 : vector<1x512xf32>
    %c0_98 = arith.constant 0 : index
    %c0_99 = arith.constant 0 : index
    %169 = vector.load %arg5[%c0_98, %c0_99] : memref<1x512xf32, #tpu.memory_space<vmem>>, vector<1x512xf32>
    tpu.vector_store %arg5[%c0_98, %c0_99], %168 {strides = array<i32>} : memref<1x512xf32, #tpu.memory_space<vmem>>, vector<1x512xf32>,
    %170 = vector.extract_strided_slice %168 {offsets = [0, 399], sizes = [1, 1], strides = [1, 1]} : vector<1x512xf32> to vector<1x1xf32>
    %cst_100 = arith.constant 0.949999988 : f32
    %171 = vector.broadcast %cst_100 : f32 to vector<1x1xf32>
    %172 = arith.mulf %171, %170 : vector<1x1xf32>
    %173 = vector.broadcast %172 : vector<1x1xf32> to vector<1x512xf32>
    %174 = arith.cmpf oge, %168, %173 : vector<1x512xf32>
    %cst_101 = arith.constant 3.000000e+38 : f32
    %175 = vector.broadcast %cst_101 : f32 to vector<1x512xf32>
    %176 = arith.select %174, %2, %175 : vector<1x512xi1>, vector<1x512xf32>
    %cst_102 = arith.constant dense<0x7F800000> : vector<1xf32>
    %177 = vector.multi_reduction <minimumf>, %176, %cst_102 [1] : vector<1x512xf32> to vector<1xf32>
    %178 = vector.shape_cast %177 : vector<1xf32> to vector<1x1xf32>
    %cst_103 = arith.constant 0.000000e+00 : f32
    %179 = vector.broadcast %cst_103 : f32 to vector<1x1xf32>
    %180 = arith.cmpf ogt, %170, %179 : vector<1x1xf32>
    %cst_104 = arith.constant 3.500000e-01 : f32
    %181 = vector.broadcast %cst_104 : f32 to vector<1x1xf32>
    %182 = arith.select %180, %178, %181 : vector<1x1xi1>, vector<1x1xf32>
    %183 = vector.shape_cast %182 : vector<1x1xf32> to vector<1x1x1xf32>
    %c0_105 = arith.constant 0 : index
    %c0_106 = arith.constant 0 : index
    %c5_107 = arith.constant 5 : index
    %184 = vector.load %arg4[%c0_105, %c0_106, %c5_107] : memref<1x1x8xf32, #tpu.memory_space<vmem>>, vector<1x1x1xf32>
    tpu.vector_store %arg4[%c0_105, %c0_106, %c5_107], %183 {strides = array<i32>} : memref<1x1x8xf32, #tpu.memory_space<vmem>>, vector<1x1x1xf32>,
    %c0_108 = arith.constant 0 : index
    %c0_109 = arith.constant 0 : index
    %c6 = arith.constant 6 : index
    %185 = vector.load %arg1[%c0_108, %c0_109, %c6] : memref<1x20x8xf32, #tpu.memory_space<vmem>>, vector<1x20x1xf32>
    %cst_110 = arith.constant 0.000000e+00 : f32
    %186 = vector.broadcast %cst_110 : f32 to vector<1x20x1xf32>
    %187 = arith.cmpf oge, %185, %186 : vector<1x20x1xf32>
    %cst_111 = arith.constant 3.000000e+38 : f32
    %188 = vector.broadcast %cst_111 : f32 to vector<1x20x1xf32>
    %189 = arith.select %187, %185, %188 : vector<1x20x1xi1>, vector<1x20x1xf32>
    %190 = vector.broadcast %189 : vector<1x20x1xf32> to vector<1x20x512xf32>
    %191 = vector.broadcast %1 : vector<1x1x512xf32> to vector<1x20x512xf32>
    %192 = arith.cmpf olt, %190, %191 : vector<1x20x512xf32>
    %193 = arith.extui %192 : vector<1x20x512xi1> to vector<1x20x512xi32>
    %194 = arith.sitofp %193 : vector<1x20x512xi32> to vector<1x20x512xf32>
    %cst_112 = arith.constant dense<0.000000e+00> : vector<1x512xf32>
    %195 = vector.multi_reduction <add>, %194, %cst_112 [1] : vector<1x20x512xf32> to vector<1x512xf32>
    %c0_113 = arith.constant 0 : index
    %c0_114 = arith.constant 0 : index
    %196 = vector.load %arg5[%c0_113, %c0_114] : memref<1x512xf32, #tpu.memory_space<vmem>>, vector<1x512xf32>
    %cst_115 = arith.constant 0.943874299 : f32
    %197 = vector.broadcast %cst_115 : f32 to vector<1x512xf32>
    %198 = arith.mulf %197, %196 : vector<1x512xf32>
    %199 = arith.addf %198, %195 : vector<1x512xf32>
    %c0_116 = arith.constant 0 : index
    %c0_117 = arith.constant 0 : index
    %200 = vector.load %arg5[%c0_116, %c0_117] : memref<1x512xf32, #tpu.memory_space<vmem>>, vector<1x512xf32>
    tpu.vector_store %arg5[%c0_116, %c0_117], %199 {strides = array<i32>} : memref<1x512xf32, #tpu.memory_space<vmem>>, vector<1x512xf32>,
    %201 = vector.extract_strided_slice %199 {offsets = [0, 399], sizes = [1, 1], strides = [1, 1]} : vector<1x512xf32> to vector<1x1xf32>
    %cst_118 = arith.constant 0.949999988 : f32
    %202 = vector.broadcast %cst_118 : f32 to vector<1x1xf32>
    %203 = arith.mulf %202, %201 : vector<1x1xf32>
    %204 = vector.broadcast %203 : vector<1x1xf32> to vector<1x512xf32>
    %205 = arith.cmpf oge, %199, %204 : vector<1x512xf32>
    %cst_119 = arith.constant 3.000000e+38 : f32
    %206 = vector.broadcast %cst_119 : f32 to vector<1x512xf32>
    %207 = arith.select %205, %2, %206 : vector<1x512xi1>, vector<1x512xf32>
    %cst_120 = arith.constant dense<0x7F800000> : vector<1xf32>
    %208 = vector.multi_reduction <minimumf>, %207, %cst_120 [1] : vector<1x512xf32> to vector<1xf32>
    %209 = vector.shape_cast %208 : vector<1xf32> to vector<1x1xf32>
    %cst_121 = arith.constant 0.000000e+00 : f32
    %210 = vector.broadcast %cst_121 : f32 to vector<1x1xf32>
    %211 = arith.cmpf ogt, %201, %210 : vector<1x1xf32>
    %cst_122 = arith.constant 3.500000e-01 : f32
    %212 = vector.broadcast %cst_122 : f32 to vector<1x1xf32>
    %213 = arith.select %211, %209, %212 : vector<1x1xi1>, vector<1x1xf32>
    %214 = vector.shape_cast %213 : vector<1x1xf32> to vector<1x1x1xf32>
    %c0_123 = arith.constant 0 : index
    %c0_124 = arith.constant 0 : index
    %c6_125 = arith.constant 6 : index
    %215 = vector.load %arg4[%c0_123, %c0_124, %c6_125] : memref<1x1x8xf32, #tpu.memory_space<vmem>>, vector<1x1x1xf32>
    tpu.vector_store %arg4[%c0_123, %c0_124, %c6_125], %214 {strides = array<i32>} : memref<1x1x8xf32, #tpu.memory_space<vmem>>, vector<1x1x1xf32>,
    %c0_126 = arith.constant 0 : index
    %c0_127 = arith.constant 0 : index
    %c7 = arith.constant 7 : index
    %216 = vector.load %arg1[%c0_126, %c0_127, %c7] : memref<1x20x8xf32, #tpu.memory_space<vmem>>, vector<1x20x1xf32>
    %cst_128 = arith.constant 0.000000e+00 : f32
    %217 = vector.broadcast %cst_128 : f32 to vector<1x20x1xf32>
    %218 = arith.cmpf oge, %216, %217 : vector<1x20x1xf32>
    %cst_129 = arith.constant 3.000000e+38 : f32
    %219 = vector.broadcast %cst_129 : f32 to vector<1x20x1xf32>
    %220 = arith.select %218, %216, %219 : vector<1x20x1xi1>, vector<1x20x1xf32>
    %221 = vector.broadcast %220 : vector<1x20x1xf32> to vector<1x20x512xf32>
    %222 = vector.broadcast %1 : vector<1x1x512xf32> to vector<1x20x512xf32>
    %223 = arith.cmpf olt, %221, %222 : vector<1x20x512xf32>
    %224 = arith.extui %223 : vector<1x20x512xi1> to vector<1x20x512xi32>
    %225 = arith.sitofp %224 : vector<1x20x512xi32> to vector<1x20x512xf32>
    %cst_130 = arith.constant dense<0.000000e+00> : vector<1x512xf32>
    %226 = vector.multi_reduction <add>, %225, %cst_130 [1] : vector<1x20x512xf32> to vector<1x512xf32>
    %c0_131 = arith.constant 0 : index
    %c0_132 = arith.constant 0 : index
    %227 = vector.load %arg5[%c0_131, %c0_132] : memref<1x512xf32, #tpu.memory_space<vmem>>, vector<1x512xf32>
    %cst_133 = arith.constant 0.943874299 : f32
    %228 = vector.broadcast %cst_133 : f32 to vector<1x512xf32>
    %229 = arith.mulf %228, %227 : vector<1x512xf32>
    %230 = arith.addf %229, %226 : vector<1x512xf32>
    %c0_134 = arith.constant 0 : index
    %c0_135 = arith.constant 0 : index
    %231 = vector.load %arg5[%c0_134, %c0_135] : memref<1x512xf32, #tpu.memory_space<vmem>>, vector<1x512xf32>
    tpu.vector_store %arg5[%c0_134, %c0_135], %230 {strides = array<i32>} : memref<1x512xf32, #tpu.memory_space<vmem>>, vector<1x512xf32>,
    %232 = vector.extract_strided_slice %230 {offsets = [0, 399], sizes = [1, 1], strides = [1, 1]} : vector<1x512xf32> to vector<1x1xf32>
    %cst_136 = arith.constant 0.949999988 : f32
    %233 = vector.broadcast %cst_136 : f32 to vector<1x1xf32>
    %234 = arith.mulf %233, %232 : vector<1x1xf32>
    %235 = vector.broadcast %234 : vector<1x1xf32> to vector<1x512xf32>
    %236 = arith.cmpf oge, %230, %235 : vector<1x512xf32>
    %cst_137 = arith.constant 3.000000e+38 : f32
    %237 = vector.broadcast %cst_137 : f32 to vector<1x512xf32>
    %238 = arith.select %236, %2, %237 : vector<1x512xi1>, vector<1x512xf32>
    %cst_138 = arith.constant dense<0x7F800000> : vector<1xf32>
    %239 = vector.multi_reduction <minimumf>, %238, %cst_138 [1] : vector<1x512xf32> to vector<1xf32>
    %240 = vector.shape_cast %239 : vector<1xf32> to vector<1x1xf32>
    %cst_139 = arith.constant 0.000000e+00 : f32
    %241 = vector.broadcast %cst_139 : f32 to vector<1x1xf32>
    %242 = arith.cmpf ogt, %232, %241 : vector<1x1xf32>
    %cst_140 = arith.constant 3.500000e-01 : f32
    %243 = vector.broadcast %cst_140 : f32 to vector<1x1xf32>
    %244 = arith.select %242, %240, %243 : vector<1x1xi1>, vector<1x1xf32>
    %245 = vector.shape_cast %244 : vector<1x1xf32> to vector<1x1x1xf32>
    %c0_141 = arith.constant 0 : index
    %c0_142 = arith.constant 0 : index
    %c7_143 = arith.constant 7 : index
    %246 = vector.load %arg4[%c0_141, %c0_142, %c7_143] : memref<1x1x8xf32, #tpu.memory_space<vmem>>, vector<1x1x1xf32>
    tpu.vector_store %arg4[%c0_141, %c0_142, %c7_143], %245 {strides = array<i32>} : memref<1x1x8xf32, #tpu.memory_space<vmem>>, vector<1x1x1xf32>,
    return
  }
  func.func @transform_0(%arg0: i32) -> (i32, i32, i32) {
    %c0_i32 = arith.constant 0 : i32
    %c0_i32_0 = arith.constant 0 : i32
    %c0_i32_1 = arith.constant 0 : i32
    return %arg0, %c0_i32, %c0_i32_0 : i32, i32, i32
  }
  func.func @transform_1(%arg0: i32) -> (i32, i32) {
    %c0_i32 = arith.constant 0 : i32
    %c0_i32_0 = arith.constant 0 : i32
    %c0_i32_1 = arith.constant 0 : i32
    return %c0_i32, %c0_i32_0 : i32, i32
  }
  func.func @transform_2(%arg0: i32) -> (i32, i32) {
    %c0_i32 = arith.constant 0 : i32
    %c0_i32_0 = arith.constant 0 : i32
    %c0_i32_1 = arith.constant 0 : i32
    return %c0_i32, %c0_i32_0 : i32, i32
  }
  func.func @transform_3(%arg0: i32) -> (i32, i32, i32) {
    %c0_i32 = arith.constant 0 : i32
    %c0_i32_0 = arith.constant 0 : i32
    %c0_i32_1 = arith.constant 0 : i32
    return %arg0, %c0_i32, %c0_i32_0 : i32, i32, i32
  }
}

</mosaic_0001>

<bundles_post_ra>
// kernel: tpu_custom_call.1
= control target key start
LH: loop header
LB: loop body
LE: loop exit
PB: predicated region body
PF: predicated region fallthrough
CT: control target
= control target key end

     0   :  { %8 = vsyncpa [#allocation4], 0  ;;  %s2838_s0 = inlined_call_operand.vmem [shape: f32[2,20,8], index: 0, kind: input, shape index: {}]   ;;  %s2839_s1 = inlined_call_operand.vmem [shape: f32[1,512], index: 1, kind: input, shape index: {}]   ;;  %s2840_s2 = inlined_call_operand.vmem [shape: f32[1,512], index: 2, kind: input, shape index: {}]   ;;  %s2841_s3 = inlined_call_operand.hbm [shape: f32[2,1,8], index: 3, kind: output, shape index: {}]  }
   0x1   :  { %10 = vsyncpa [#allocation4 + $0x1], 0  ;;  %s2045_s12 = smov 0   ;;  %s2047_s13 = smov 0  }
   0x2   :  { %s2049_s14 = smov 0   ;;  %s2051_s15 = smov 0  }
   0x3 LB: > { %s2066_s16 = sadd.s32 4294967295, %s2003_s15   ;;  %s1759_s17 = sadd.s32 4294967294, %s2003_s15   ;;  %s2003_s15 = sphi %s2051_s15, %s2849_s15   ;;  %s1999_s14 = sphi %s2049_s14, %s2848_s14   ;;  %s1995_s13 = sphi %s2047_s13, %s2847_s13   ;;  %s1991_s12 = sphi %s2045_s12, %s2846_s12  }
   0x4   : > { %s2070_s18 = sadd.s32 1, %s2003_s15   ;;  %s91_s19 = sadd.s32 1, %s1999_s14 }
   0x5   : > { %s88_s20 = ssub.s32 %s2003_s15, %s2070_s18  ;;  %p101_p0 = scmp.ne.s32.totalorder %s1999_s14, %s1995_s13 }
   0x6   : > { %p89_p1 = scmp.eq.s32.totalorder %s88_s20, 0  ;;  %p102_p2 = scmp.eq.s32.totalorder %s2066_s16, 1 }
   0x7   : > { %p107_p3 = scmp.ne.s32.totalorder %s1995_s13, %s1991_s12  ;;  %p108_p4 = scmp.eq.s32.totalorder %s1759_s17, 1 }
   0x8   : > { %s2081_s21 = scalar_select %p89_p1, %s1999_s14, %s91_s19  }
   0x9   : > { %p2083_p5 = por %p102_p2, %p101_p0  ;;  %p2087_p6 = por %p108_p4, %p107_p3 }
   0xa   : > { %p1762_p7 = scmp.ge.s32.totalorder %s2003_s15, 1  ;;  %p140_p8 = scmp.lt.s32.totalorder %s2003_s15, 3 }
   0xc   : > { %p141_p9 = pnand %p1762_p7, %p140_p8 }
   0xd   : > { %p163_p10 = scmp.lt.s32.totalorder (!%p141_p9), %s2066_s16, 1  ;;  %v2005_v0 = vmov (!%p141_p9), 0   ;;  %v2006_v8 = vmov (!%p141_p9), 1   ;;  %v2007_v11 = vmov (!%p141_p9), 2   ;;  %v2008_v13 = vmov (!%p141_p9), 3   ;;  %s2015_s4 = smov (!%p141_p9), 113  }
   0xe   : > { %144 = sbr.rel (%p141_p9) target bundleno = 907 (0x38b), region = 32  ;;  %1923 = vset.pattern.permute.xlu1 (!%p141_p9), %v2005_v0  ;;  %1922 = vset.pattern.permute.xlu0 (!%p141_p9), %v2005_v0  ;;  %v2009_v15 = vmov (!%p141_p9), 4   ;;  %v2010_v18 = vmov (!%p141_p9), 5   ;;  %v2011_v20 = vmov (!%p141_p9), 6   ;;  %v2012_v22 = vmov (!%p141_p9), 7   ;;  %s2017_s7 = smov (!%p141_p9), 1  }
   0xf   : > { %v195_v28 = vlaneseq (!%p141_p9)  ;;  %v168_v34 = vld [vmem:[%s2839_s1] sm:$0xf] (!%p141_p9)  ;;  %v2013_v35 = vmov (!%p141_p9), 1966171168   ;;  %vm252_vm10 = vcmask (!%p141_p9), 1043456   ;;  %v2014_v43 = vmov (!%p141_p9), 0.0  }
  0x10   : > { %v2141_v36 = vunpack.c.l.s4 (!%p141_p9), %v2013_v35  ;;  %s2018_s8 = smov (!%p141_p9), 2   ;;  %s2019_s9 = smov (!%p141_p9), 4  }
  0x11   : > { %v2124_v29 = vshrl.u32 (!%p141_p9), %v195_v28, 7  ;;  %s161_s10 = sand.u32 (!%p141_p9), 1, %s1995_s13   ;;  %s2020_s17 = smov (!%p141_p9), 3  }
  0x12   : > { %v296_v42 = vunpack.c.0.s8 (!%p141_p9), %v2141_v36  ;;  %s2767_s11 = scalar_lea.vmem (!%p141_p9), [#allocation3], %s161_s10  ;;  %s2021_s19 = smov (!%p141_p9), 5  }
  0x13   : > { %v2127_v30 = vsub.s32 (!%p141_p9), 0, %v2124_v29  ;;  %v2130_v31 = vsub.s32 (!%p141_p9), 1, %v2124_v29  ;;  %v2133_v32 = vsub.s32 (!%p141_p9), 2, %v2124_v29  ;;  %v2136_v33 = vsub.s32 (!%p141_p9), 3, %v2124_v29  ;;  %s2022_s20 = smov (!%p141_p9), 6   ;;  %s1704_s26 = sshll.u32 (!%p141_p9), %s2767_s11, 4  ;;  %s2795_s26 = int_to_ptr.vmem [resolvable:$true] %s1704_s26 }
  0x14   : > { %s1692_s30 = scalar_lea.sflag (!%p141_p9), [#allocation4], %s161_s10 }
  0x15   : > { %s164_s24 = scalar_select %p163_p10, %s2066_s16, 1  ;;  %v2144_v37 = vrot.slane %v168_v34, %v2127_v30  ;;  %v2147_v38 = vrot.slane %v168_v34, %v2130_v31  ;;  %v2150_v39 = vrot.slane %v168_v34, %v2133_v32  ;;  %v2153_v40 = vrot.slane %v168_v34, %v2136_v33 }
  0x17   : > { %s1863_s25 = smul.u32 24, %s164_s24  ;;  %s2023_s24 = smov 7  }
  0x19   : > { %s2100_s28 = scalar_lea.vmem %s2838_s0, %s1863_s25  ;;  %s1860_s25 = sshll.u32 %s2066_s16, 4 }
  0x1a   : > { %v172_v1 = vld [vmem:[%s2100_s28 + $0x10] sm:$0xf]  ;;  %v170_v2 = vld [vmem:[%s2100_s28] sm:$0xff]  ;;  %v171_v3 = vld [vmem:[%s2100_s28 + $0x8] sm:$0xff]  ;;  %s2793_s29 = scalar_lea.hbm %s2841_s3, %s1860_s25  ;;  %s2024_s16 = smov [#allocation3]  }
  0x1b   : > { %vm175_vm0 = vcmp.ge.f32.partialorder %v172_v1, 0.0  ;;  %vm173_vm1 = vcmp.ge.f32.partialorder %v170_v2, 0.0  ;;  %vm174_vm2 = vcmp.ge.f32.partialorder %v171_v3, 0.0  ;;  %v377_v6 = vld [vmem:[%s2100_s28 + $0x10] sm:$0xf]  ;;  %s1945_s5 = sshll.u32 %s2024_s16, 4  ;;  %s1946_s5 = int_to_ptr.vmem [resolvable:$false] %s1945_s5 }
  0x1c   : > { %v178_v4 = vsel %vm175_vm0, %v172_v1, 3e+38  ;;  %v2105_v5 = vsel %vm173_vm1, %v170_v2, 3e+38  ;;  %v177_v7 = vsel %vm174_vm2, %v171_v3, 3e+38  ;;  %p1948_p0 = scmp.lt.s32.totalorder %s2795_s26, %s1946_s5 }
  0x1d   : > { %191 = vperm.xlu1 %1923, %v178_v4   ;;  %181 = vperm.xlu0 %1922, %v2105_v5   ;;  %vm380_vm3 = vcmp.ge.f32.partialorder %v377_v6, 0.0  ;;  %v565_v10 = vld [vmem:[%s2100_s28 + $0x10] sm:$0xf]  ;;  %s1947_s6 = scalar_lea.vmem %s1946_s5, 32 }
  0x1e   : > { %v383_v9 = vsel %vm380_vm3, %v377_v6, 3e+38  ;;  %vm568_vm4 = vcmp.ge.f32.partialorder %v565_v10, 0.0  ;;  %v753_v14 = vld [vmem:[%s2100_s28 + $0x10] sm:$0xf] }
  0x1f   : > { %v571_v12 = vsel %vm568_vm4, %v565_v10, 3e+38  ;;  %vm756_vm5 = vcmp.ge.f32.partialorder %v753_v14, 0.0  ;;  %v941_v17 = vld [vmem:[%s2100_s28 + $0x10] sm:$0xf] }
  0x20   : > { %v759_v16 = vsel %vm756_vm5, %v753_v14, 3e+38  ;;  %vm944_vm6 = vcmp.ge.f32.partialorder %v941_v17, 0.0  ;;  %v1129_v21 = vld [vmem:[%s2100_s28 + $0x10] sm:$0xf] }
  0x21   : > { %1924 = vset.pattern.permute.xlu1 %v2006_v8  ;;  %186 = vperm.xlu0 %1922, %v177_v7   ;;  %v947_v19 = vsel %vm944_vm6, %v941_v17, 3e+38  ;;  %vm1132_vm7 = vcmp.ge.f32.partialorder %v1129_v21, 0.0  ;;  %v1317_v24 = vld [vmem:[%s2100_s28 + $0x10] sm:$0xf] }
  0x22   : > { %386 = vperm.xlu1 %1924, %v2105_v5   ;;  %v1135_v23 = vsel %vm1132_vm7, %v1129_v21, 3e+38  ;;  %vm1320_vm8 = vcmp.ge.f32.partialorder %v1317_v24, 0.0  ;;  %v1505_v26 = vld [vmem:[%s2100_s28 + $0x10] sm:$0xf] }
  0x23   : > { %v1323_v25 = vsel %vm1320_vm8, %v1317_v24, 3e+38  ;;  %vm1508_vm9 = vcmp.ge.f32.partialorder %v1505_v26, 0.0 }
  0x24   : > { %v1511_v27 = vsel %vm1508_vm9, %v1505_v26, 3e+38 }
  0x25   : > { %1925 = vset.pattern.permute.xlu0 %v2006_v8 }
  0x26   : > { %396 = vperm.xlu1 %1924, %v383_v9   ;;  %391 = vperm.xlu0 %1925, %v177_v7  }
  0x2a   : > { %1926 = vset.pattern.permute.xlu1 %v2007_v11  ;;  %1927 = vset.pattern.permute.xlu0 %v2007_v11 }
  0x2b   : > { %574 = vperm.xlu1 %1926, %v2105_v5   ;;  %579 = vperm.xlu0 %1927, %v177_v7  }
  0x2f   : > { %584 = vperm.xlu1 %1926, %v571_v12   ;;  %1929 = vset.pattern.permute.xlu0 %v2008_v13 }
  0x30   : > { %767 = vperm.xlu0 %1929, %v177_v7  }
  0x33   : > { %1928 = vset.pattern.permute.xlu1 %v2008_v13 }
  0x34   : > { %762 = vperm.xlu1 %1928, %v2105_v5   ;;  %1931 = vset.pattern.permute.xlu0 %v2009_v15 }
  0x35   : > { %955 = vperm.xlu0 %1931, %v177_v7  }
  0x38   : > { %772 = vperm.xlu1 %1928, %v759_v16  }
  0x39   : > { %1933 = vset.pattern.permute.xlu0 %v2010_v18 }
  0x3a   : > { %1143 = vperm.xlu0 %1933, %v177_v7  }
  0x3c   : > { %1930 = vset.pattern.permute.xlu1 %v2009_v15 }
  0x3d   : > { %950 = vperm.xlu1 %1930, %v2105_v5  }
  0x3e   : > { %1935 = vset.pattern.permute.xlu0 %v2011_v20 }
  0x3f   : > { %1331 = vperm.xlu0 %1935, %v177_v7  }
  0x41   : > { %960 = vperm.xlu1 %1930, %v947_v19  }
  0x43   : > { %1937 = vset.pattern.permute.xlu0 %v2012_v22 }
  0x44   : > { %1519 = vperm.xlu0 %1937, %v177_v7  }
  0x45   : > { %1932 = vset.pattern.permute.xlu1 %v2010_v18 }
  0x46   : > { %1138 = vperm.xlu1 %1932, %v2105_v5  }
  0x4a   : > { %1148 = vperm.xlu1 %1932, %v1135_v23  }
  0x4e   : > { %1934 = vset.pattern.permute.xlu1 %v2011_v20 }
  0x4f   : > { %1326 = vperm.xlu1 %1934, %v2105_v5  }
  0x53   : > { %1336 = vperm.xlu1 %1934, %v1323_v25  }
  0x57   : > { %1936 = vset.pattern.permute.xlu1 %v2012_v22 }
  0x58   : > { %1514 = vperm.xlu1 %1936, %v2105_v5  }
  0x5c   : > { %1524 = vperm.xlu1 %1936, %v1511_v27  }
  0x60   : > { %1940 = vset.pattern.permute.xlu1 %v2005_v0 }
  0x9c   : > { %v182_v41 = vpop.permute.xlu0 %181  ;;  %v192_v48 = vpop.permute.xlu1 %191 }
  0x9d   : > { %vm215_vm11 = vcmp.lt.f32.partialorder %v182_v41, %v2144_v37  ;;  %vm216_vm12 = vcmp.lt.f32.partialorder %v182_v41, %v2147_v38  ;;  %vm217_vm13 = vcmp.lt.f32.partialorder %v182_v41, %v2150_v39  ;;  %vm218_vm14 = vcmp.lt.f32.partialorder %v182_v41, %v2153_v40 }
  0x9e   : > { %v1764_v44 = vsel %vm215_vm11, 1.0, %v2014_v43  ;;  %v1765_v45 = vsel %vm216_vm12, 1.0, %v2014_v43  ;;  %v1766_v46 = vsel %vm217_vm13, 1.0, %v2014_v43  ;;  %v1767_v47 = vsel %vm218_vm14, 1.0, %v2014_v43 }
  0x9f   : > { %vm223_vm15 = vcmp.lt.f32.partialorder %v192_v48, %v2144_v37  ;;  %vm224_vm0 = vcmp.lt.f32.partialorder %v192_v48, %v2147_v38  ;;  %vm225_vm1 = vcmp.lt.f32.partialorder %v192_v48, %v2150_v39  ;;  %vm226_vm2 = vcmp.lt.f32.partialorder %v192_v48, %v2153_v40 }
  0xa0   : > { %v1772_v49 = vsel %vm223_vm15, 1.0, %v2014_v43  ;;  %v1773_v50 = vsel %vm224_vm0, 1.0, %v2014_v43  ;;  %v1774_v51 = vsel %vm225_vm1, 1.0, %v2014_v43  ;;  %v1775_v52 = vsel %vm226_vm2, 1.0, %v2014_v43  ;;  %v187_v53 = vpop.permute.xlu0 %186 }
  0xa1   : > { %v253_v54 = vsel %vm252_vm10, %v1772_v49, 0.0  ;;  %v262_v55 = vsel %vm252_vm10, %v1773_v50, 0.0  ;;  %v271_v56 = vsel %vm252_vm10, %v1774_v51, 0.0  ;;  %v280_v57 = vsel %vm252_vm10, %v1775_v52, 0.0  ;;  %v387_v3 = vpop.permute.xlu1 %386 }
  0xa2   : > { %vm219_vm3 = vcmp.lt.f32.partialorder %v187_v53, %v2144_v37  ;;  %vm220_vm4 = vcmp.lt.f32.partialorder %v187_v53, %v2147_v38  ;;  %vm221_vm5 = vcmp.lt.f32.partialorder %v187_v53, %v2150_v39  ;;  %vm222_vm6 = vcmp.lt.f32.partialorder %v187_v53, %v2153_v40 }
  0xa3   : > { %v1768_v58 = vsel %vm219_vm3, 1.0, %v2014_v43  ;;  %v1769_v59 = vsel %vm220_vm4, 1.0, %v2014_v43  ;;  %v1770_v60 = vsel %vm221_vm5, 1.0, %v2014_v43  ;;  %v1771_v61 = vsel %vm222_vm6, 1.0, %v2014_v43 }
  0xa4   : > { %v251_v62 = vadd.f32 %v1768_v58, %v1764_v44  ;;  %v261_v63 = vadd.f32 %v1769_v59, %v1765_v45  ;;  %v270_v1 = vadd.f32 %v1770_v60, %v1766_v46  ;;  %v279_v2 = vadd.f32 %v1771_v61, %v1767_v47 }
  0xa5   : > { %vm399_vm7 = vcmp.lt.f32.partialorder %v387_v3, %v2144_v37  ;;  %vm400_vm8 = vcmp.lt.f32.partialorder %v387_v3, %v2147_v38  ;;  %vm401_vm9 = vcmp.lt.f32.partialorder %v387_v3, %v2150_v39  ;;  %vm402_vm11 = vcmp.lt.f32.partialorder %v387_v3, %v2153_v40  ;;  %v392_v8 = vpop.permute.xlu0 %391  ;;  %v397_v35 = vpop.permute.xlu1 %396 }
  0xa6   : > { %v254_v4 = vadd.f32 %v253_v54, %v251_v62  ;;  %v263_v5 = vadd.f32 %v262_v55, %v261_v63  ;;  %v272_v6 = vadd.f32 %v271_v56, %v270_v1  ;;  %v281_v7 = vadd.f32 %v280_v57, %v279_v2 }
  0xa7   : > { %v1776_v9 = vsel %vm399_vm7, 1.0, %v2014_v43  ;;  %v1777_v10 = vsel %vm400_vm8, 1.0, %v2014_v43  ;;  %v1778_v11 = vsel %vm401_vm9, 1.0, %v2014_v43  ;;  %v1779_v12 = vsel %vm402_vm11, 1.0, %v2014_v43 }
  0xa8   : > { %v255_v13 = vrot.slane %v254_v4, 4  ;;  %v264_v14 = vrot.slane %v263_v5, 4  ;;  %v273_v15 = vrot.slane %v272_v6, 4  ;;  %v282_v16 = vrot.slane %v281_v7, 4 }
  0xa9   : > { %vm403_vm12 = vcmp.lt.f32.partialorder %v392_v8, %v2144_v37  ;;  %vm404_vm13 = vcmp.lt.f32.partialorder %v392_v8, %v2147_v38  ;;  %vm405_vm14 = vcmp.lt.f32.partialorder %v392_v8, %v2150_v39  ;;  %vm406_vm15 = vcmp.lt.f32.partialorder %v392_v8, %v2153_v40 }
  0xaa   : > { %v256_v17 = vadd.f32 %v255_v13, %v254_v4  ;;  %v265_v18 = vadd.f32 %v264_v14, %v263_v5  ;;  %v274_v19 = vadd.f32 %v273_v15, %v272_v6  ;;  %v283_v20 = vadd.f32 %v282_v16, %v281_v7  ;;  %v580_v36 = vpop.permute.xlu0 %579 }
  0xab   : > { %v1780_v21 = vsel %vm403_vm12, 1.0, %v2014_v43  ;;  %v1781_v22 = vsel %vm404_vm13, 1.0, %v2014_v43  ;;  %v1782_v23 = vsel %vm405_vm14, 1.0, %v2014_v43  ;;  %v1783_v24 = vsel %vm406_vm15, 1.0, %v2014_v43 }
  0xac   : > { %v257_v25 = vrot.slane %v256_v17, 2  ;;  %v266_v26 = vrot.slane %v265_v18, 2  ;;  %v275_v27 = vrot.slane %v274_v19, 2  ;;  %v284_v34 = vrot.slane %v283_v20, 2 }
  0xad   : > { %v435_v41 = vadd.f32 %v1780_v21, %v1776_v9  ;;  %v444_v44 = vadd.f32 %v1781_v22, %v1777_v10  ;;  %v453_v45 = vadd.f32 %v1782_v23, %v1778_v11  ;;  %v462_v46 = vadd.f32 %v1783_v24, %v1779_v12  ;;  %v575_v9 = vpop.permute.xlu1 %574 }
  0xae   : > { %v258_v47 = vadd.f32 %v257_v25, %v256_v17  ;;  %v267_v48 = vadd.f32 %v266_v26, %v265_v18  ;;  %v276_v49 = vadd.f32 %v275_v27, %v274_v19  ;;  %v285_v50 = vadd.f32 %v284_v34, %v283_v20 }
  0xaf   : > { %vm407_vm0 = vcmp.lt.f32.partialorder %v397_v35, %v2144_v37  ;;  %vm408_vm1 = vcmp.lt.f32.partialorder %v397_v35, %v2147_v38  ;;  %vm409_vm2 = vcmp.lt.f32.partialorder %v397_v35, %v2150_v39  ;;  %vm410_vm3 = vcmp.lt.f32.partialorder %v397_v35, %v2153_v40 }
  0xb0   : > { %v259_v51 = vrot.slane %v258_v47, 1  ;;  %v268_v52 = vrot.slane %v267_v48, 1  ;;  %v277_v53 = vrot.slane %v276_v49, 1  ;;  %v286_v54 = vrot.slane %v285_v50, 1 }
  0xb1   : > { %v1784_v55 = vsel %vm407_vm0, 1.0, %v2014_v43  ;;  %v1785_v56 = vsel %vm408_vm1, 1.0, %v2014_v43  ;;  %v1786_v57 = vsel %vm409_vm2, 1.0, %v2014_v43  ;;  %v1787_v58 = vsel %vm410_vm3, 1.0, %v2014_v43 }
  0xb2   : > { %v2208_v59 = vadd.f32 %v259_v51, %v258_v47  ;;  %v2210_v60 = vadd.f32 %v268_v52, %v267_v48  ;;  %v2212_v61 = vadd.f32 %v277_v53, %v276_v49  ;;  %v2214_v62 = vadd.f32 %v286_v54, %v285_v50 }
  0xb3   : > { %v436_v63 = vsel %vm252_vm10, %v1784_v55, 0.0  ;;  %v445_v1 = vsel %vm252_vm10, %v1785_v56, 0.0  ;;  %v454_v2 = vsel %vm252_vm10, %v1786_v57, 0.0  ;;  %v463_v3 = vsel %vm252_vm10, %v1787_v58, 0.0 }
  0xb4   : > { %v437_v4 = vadd.f32 %v436_v63, %v435_v41  ;;  %v446_v5 = vadd.f32 %v445_v1, %v444_v44  ;;  %v2223_v6 = vsub.s32 %v296_v42, %v2124_v29  ;;  %v455_v7 = vadd.f32 %v454_v2, %v453_v45  ;;  %v585_v45 = vpop.permute.xlu1 %584 }
  0xb5   : > { %v464_v8 = vadd.f32 %v463_v3, %v462_v46  ;;  %vm587_vm4 = vcmp.lt.f32.partialorder %v575_v9, %v2144_v37  ;;  %vm588_vm5 = vcmp.lt.f32.partialorder %v575_v9, %v2147_v38  ;;  %v292_v12 = vcombine.low %v2208_v59, %v2210_v60 }
  0xb6   : > { %v438_v10 = vrot.slane %v437_v4, 4  ;;  %v447_v11 = vrot.slane %v446_v5, 4  ;;  %v293_v13 = vcombine.low %v2212_v61, %v2214_v62  ;;  %v456_v14 = vrot.slane %v455_v7, 4 }
  0xb7   : > { %v465_v15 = vrot.slane %v464_v8, 4  ;;  %vm589_vm6 = vcmp.lt.f32.partialorder %v575_v9, %v2150_v39  ;;  %vm590_vm7 = vcmp.lt.f32.partialorder %v575_v9, %v2153_v40  ;;  %v1788_v18 = vsel %vm587_vm4, 1.0, %v2014_v43 }
  0xb8   : > { %v439_v29 = vadd.f32 %v438_v10, %v437_v4  ;;  %v448_v42 = vadd.f32 %v447_v11, %v446_v5  ;;  %v457_v16 = vadd.f32 %v456_v14, %v455_v7  ;;  %v1789_v19 = vsel %vm588_vm5, 1.0, %v2014_v43 }
  0xb9   : > { %v466_v17 = vadd.f32 %v465_v15, %v464_v8  ;;  %vm591_vm8 = vcmp.lt.f32.partialorder %v580_v36, %v2144_v37  ;;  %vm592_vm9 = vcmp.lt.f32.partialorder %v580_v36, %v2147_v38  ;;  %vm593_vm11 = vcmp.lt.f32.partialorder %v580_v36, %v2150_v39  ;;  %v763_v8 = vpop.permute.xlu1 %762 }
  0xba   : > { %v440_v20 = vrot.slane %v439_v29, 2  ;;  %v449_v21 = vrot.slane %v448_v42, 2  ;;  %v458_v22 = vrot.slane %v457_v16, 2  ;;  %vm594_vm12 = vcmp.lt.f32.partialorder %v580_v36, %v2153_v40 }
  0xbb   : > { %v467_v23 = vrot.slane %v466_v17, 2  ;;  %v1790_v24 = vsel %vm589_vm6, 1.0, %v2014_v43  ;;  %v1791_v25 = vsel %vm590_vm7, 1.0, %v2014_v43  ;;  %v1792_v26 = vsel %vm591_vm8, 1.0, %v2014_v43 }
  0xbc   : > { %v1793_v27 = vsel %vm592_vm9, 1.0, %v2014_v43  ;;  %v2244_v34 = vrot.slane %v292_v12, %v2223_v6  ;;  %v2247_v35 = vrot.slane %v293_v13, %v2223_v6  ;;  %v1794_v41 = vsel %vm593_vm11, 1.0, %v2014_v43  ;;  %v768_v13 = vpop.permute.xlu0 %767 }
  0xbd   : > { %v1795_v44 = vsel %vm594_vm12, 1.0, %v2014_v43  ;;  %v2251_v46 = vadd.f32 %v440_v20, %v439_v29  ;;  %v2253_v47 = vadd.f32 %v449_v21, %v448_v42  ;;  %v2255_v48 = vadd.f32 %v458_v22, %v457_v16 }
  0xbe   : > { %v2257_v49 = vadd.f32 %v467_v23, %v466_v17  ;;  %v623_v50 = vadd.f32 %v1792_v26, %v1788_v18  ;;  %v632_v51 = vadd.f32 %v1793_v27, %v1789_v19  ;;  %v641_v52 = vadd.f32 %v1794_v41, %v1790_v24 }
  0xbf   : > { %v650_v53 = vadd.f32 %v1795_v44, %v1791_v25  ;;  %vm595_vm13 = vcmp.lt.f32.partialorder %v585_v45, %v2144_v37  ;;  %vm596_vm14 = vcmp.lt.f32.partialorder %v585_v45, %v2147_v38  ;;  %vm597_vm15 = vcmp.lt.f32.partialorder %v585_v45, %v2150_v39 }
  0xc0   : > { %vm598_vm0 = vcmp.lt.f32.partialorder %v585_v45, %v2153_v40  ;;  %v1796_v54 = vsel %vm595_vm13, 1.0, %v2014_v43  ;;  %v1797_v55 = vsel %vm596_vm14, 1.0, %v2014_v43  ;;  %v1798_v56 = vsel %vm597_vm15, 1.0, %v2014_v43 }
  0xc1   : > { %v1799_v57 = vsel %vm598_vm0, 1.0, %v2014_v43  ;;  %v624_v58 = vsel %vm252_vm10, %v1796_v54, 0.0  ;;  %v633_v63 = vsel %vm252_vm10, %v1797_v55, 0.0  ;;  %v642_v1 = vsel %vm252_vm10, %v1798_v56, 0.0 }
  0xc2   : > { %v651_v2 = vsel %vm252_vm10, %v1799_v57, 0.0  ;;  %v625_v3 = vadd.f32 %v624_v58, %v623_v50  ;;  %v634_v4 = vadd.f32 %v633_v63, %v632_v51  ;;  %v643_v5 = vadd.f32 %v642_v1, %v641_v52  ;;  %v773_v50 = vpop.permute.xlu1 %772 }
  0xc3   : > { %v652_v7 = vadd.f32 %v651_v2, %v650_v53  ;;  %vm775_vm1 = vcmp.lt.f32.partialorder %v763_v8, %v2144_v37  ;;  %vm776_vm2 = vcmp.lt.f32.partialorder %v763_v8, %v2147_v38  ;;  %vm777_vm3 = vcmp.lt.f32.partialorder %v763_v8, %v2150_v39 }
  0xc4   : > { %vm778_vm4 = vcmp.lt.f32.partialorder %v763_v8, %v2153_v40  ;;  %v626_v9 = vrot.slane %v625_v3, 4  ;;  %v635_v10 = vrot.slane %v634_v4, 4  ;;  %v644_v11 = vrot.slane %v643_v5, 4 }
  0xc5   : > { %v653_v12 = vrot.slane %v652_v7, 4  ;;  %v1800_v14 = vsel %vm775_vm1, 1.0, %v2014_v43  ;;  %v1801_v15 = vsel %vm776_vm2, 1.0, %v2014_v43  ;;  %v1802_v36 = vsel %vm777_vm3, 1.0, %v2014_v43 }
  0xc6   : > { %v1803_v29 = vsel %vm778_vm4, 1.0, %v2014_v43  ;;  %v627_v42 = vadd.f32 %v626_v9, %v625_v3  ;;  %v636_v16 = vadd.f32 %v635_v10, %v634_v4  ;;  %v645_v17 = vadd.f32 %v644_v11, %v643_v5 }
  0xc7   : > { %v654_v18 = vadd.f32 %v653_v12, %v652_v7  ;;  %vm779_vm5 = vcmp.lt.f32.partialorder %v768_v13, %v2144_v37  ;;  %vm780_vm6 = vcmp.lt.f32.partialorder %v768_v13, %v2147_v38  ;;  %vm781_vm7 = vcmp.lt.f32.partialorder %v768_v13, %v2150_v39 }
  0xc8   : > { %vm782_vm8 = vcmp.lt.f32.partialorder %v768_v13, %v2153_v40  ;;  %v628_v19 = vrot.slane %v627_v42, 2  ;;  %v637_v20 = vrot.slane %v636_v16, 2  ;;  %v646_v21 = vrot.slane %v645_v17, 2  ;;  %v951_v13 = vpop.permute.xlu1 %950 }
  0xc9   : > { %v655_v22 = vrot.slane %v654_v18, 2  ;;  %v1804_v23 = vsel %vm779_vm5, 1.0, %v2014_v43  ;;  %v1805_v24 = vsel %vm780_vm6, 1.0, %v2014_v43  ;;  %v1806_v25 = vsel %vm781_vm7, 1.0, %v2014_v43 }
  0xca   : > { %v1807_v26 = vsel %vm782_vm8, 1.0, %v2014_v43  ;;  %v442_v27 = vrot.slane %v2251_v46, 1  ;;  %v451_v41 = vrot.slane %v2253_v47, 1  ;;  %v460_v44 = vrot.slane %v2255_v48, 1 }
  0xcb   : > { %v469_v45 = vrot.slane %v2257_v49, 1  ;;  %v2291_v51 = vadd.f32 %v628_v19, %v627_v42  ;;  %v2293_v52 = vadd.f32 %v637_v20, %v636_v16  ;;  %v2295_v53 = vadd.f32 %v646_v21, %v645_v17  ;;  %v956_v42 = vpop.permute.xlu0 %955 }
  0xcc   : > { %v2297_v54 = vadd.f32 %v655_v22, %v654_v18  ;;  %v811_v55 = vadd.f32 %v1804_v23, %v1800_v14  ;;  %v820_v56 = vadd.f32 %v1805_v24, %v1801_v15  ;;  %v829_v57 = vadd.f32 %v1806_v25, %v1802_v36 }
  0xcd   : > { %v838_v58 = vadd.f32 %v1807_v26, %v1803_v29  ;;  %vm783_vm9 = vcmp.lt.f32.partialorder %v773_v50, %v2144_v37  ;;  %vm784_vm11 = vcmp.lt.f32.partialorder %v773_v50, %v2147_v38  ;;  %vm785_vm12 = vcmp.lt.f32.partialorder %v773_v50, %v2150_v39 }
  0xce   : > { %vm786_vm13 = vcmp.lt.f32.partialorder %v773_v50, %v2153_v40  ;;  %v1808_v63 = vsel %vm783_vm9, 1.0, %v2014_v43  ;;  %v1809_v1 = vsel %vm784_vm11, 1.0, %v2014_v43  ;;  %v1810_v2 = vsel %vm785_vm12, 1.0, %v2014_v43 }
  0xcf   : > { %v1811_v3 = vsel %vm786_vm13, 1.0, %v2014_v43  ;;  %v812_v4 = vsel %vm252_vm10, %v1808_v63, 0.0  ;;  %v821_v5 = vsel %vm252_vm10, %v1809_v1, 0.0  ;;  %v830_v7 = vsel %vm252_vm10, %v1810_v2, 0.0 }
  0xd0   : > { %v839_v8 = vsel %vm252_vm10, %v1811_v3, 0.0  ;;  %v813_v9 = vadd.f32 %v812_v4, %v811_v55  ;;  %v822_v10 = vadd.f32 %v821_v5, %v820_v56  ;;  %v831_v11 = vadd.f32 %v830_v7, %v829_v57  ;;  %v961_v4 = vpop.permute.xlu1 %960 }
  0xd1   : > { %v840_v12 = vadd.f32 %v839_v8, %v838_v58  ;;  %vm963_vm14 = vcmp.lt.f32.partialorder %v951_v13, %v2144_v37  ;;  %vm964_vm15 = vcmp.lt.f32.partialorder %v951_v13, %v2147_v38  ;;  %vm965_vm0 = vcmp.lt.f32.partialorder %v951_v13, %v2150_v39 }
  0xd2   : > { %vm966_vm1 = vcmp.lt.f32.partialorder %v951_v13, %v2153_v40  ;;  %v814_v14 = vrot.slane %v813_v9, 4  ;;  %v823_v15 = vrot.slane %v822_v10, 4  ;;  %v832_v36 = vrot.slane %v831_v11, 4 }
  0xd3   : > { %v841_v29 = vrot.slane %v840_v12, 4  ;;  %v1812_v16 = vsel %vm963_vm14, 1.0, %v2014_v43  ;;  %v1813_v17 = vsel %vm964_vm15, 1.0, %v2014_v43  ;;  %v1814_v18 = vsel %vm965_vm0, 1.0, %v2014_v43 }
  0xd4   : > { %v1815_v19 = vsel %vm966_vm1, 1.0, %v2014_v43  ;;  %v815_v20 = vadd.f32 %v814_v14, %v813_v9  ;;  %v824_v21 = vadd.f32 %v823_v15, %v822_v10  ;;  %v833_v22 = vadd.f32 %v832_v36, %v831_v11 }
  0xd5   : > { %v842_v23 = vadd.f32 %v841_v29, %v840_v12  ;;  %vm967_vm2 = vcmp.lt.f32.partialorder %v956_v42, %v2144_v37  ;;  %vm968_vm3 = vcmp.lt.f32.partialorder %v956_v42, %v2147_v38  ;;  %vm969_vm4 = vcmp.lt.f32.partialorder %v956_v42, %v2150_v39 }
  0xd6   : > { %vm970_vm5 = vcmp.lt.f32.partialorder %v956_v42, %v2153_v40  ;;  %v816_v24 = vrot.slane %v815_v20, 2  ;;  %v825_v25 = vrot.slane %v824_v21, 2  ;;  %v834_v26 = vrot.slane %v833_v22, 2 }
  0xd7   : > { %v843_v50 = vrot.slane %v842_v23, 2  ;;  %v1816_v55 = vsel %vm967_vm2, 1.0, %v2014_v43  ;;  %v1817_v56 = vsel %vm968_vm3, 1.0, %v2014_v43  ;;  %v1818_v57 = vsel %vm969_vm4, 1.0, %v2014_v43 }
  0xd8   : > { %v1819_v58 = vsel %vm970_vm5, 1.0, %v2014_v43  ;;  %v630_v63 = vrot.slane %v2291_v51, 1  ;;  %v639_v1 = vrot.slane %v2293_v52, 1  ;;  %v648_v2 = vrot.slane %v2295_v53, 1 }
  0xd9   : > { %v657_v3 = vrot.slane %v2297_v54, 1  ;;  %vm2332_vm6 = vcmp.lt.s32.totalorder %v195_v28, 512  ;;  %v2336_v7 = vadd.f32 %v816_v24, %v815_v20  ;;  %v2338_v8 = vadd.f32 %v825_v25, %v824_v21 }
  0xda   : > { %v2340_v9 = vadd.f32 %v834_v26, %v833_v22  ;;  %v2342_v10 = vadd.f32 %v843_v50, %v842_v23  ;;  %v999_v11 = vadd.f32 %v1816_v55, %v1812_v16  ;;  %v1008_v12 = vadd.f32 %v1817_v56, %v1813_v17 }
  0xdb   : > { %v1017_v13 = vadd.f32 %v1818_v57, %v1814_v18  ;;  %v1026_v14 = vadd.f32 %v1819_v58, %v1815_v19  ;;  %vm971_vm7 = vcmp.lt.f32.partialorder %v961_v4, %v2144_v37  ;;  %vm972_vm8 = vcmp.lt.f32.partialorder %v961_v4, %v2147_v38 }
  0xdc   : > { %vm973_vm9 = vcmp.lt.f32.partialorder %v961_v4, %v2150_v39  ;;  %vm974_vm11 = vcmp.lt.f32.partialorder %v961_v4, %v2153_v40  ;;  %v1820_v28 = vsel %vm971_vm7, 1.0, %v2014_v43  ;;  %v1821_v15 = vsel %vm972_vm8, 1.0, %v2014_v43 }
  0xdd   : > { %v1822_v36 = vsel %vm973_vm9, 1.0, %v2014_v43  ;;  %v1823_v29 = vsel %vm974_vm11, 1.0, %v2014_v43  ;;  %v1000_v42 = vsel %vm252_vm10, %v1820_v28, 0.0  ;;  %v1009_v16 = vsel %vm252_vm10, %v1821_v15, 0.0 }
  0xde   : > { %v1018_v17 = vsel %vm252_vm10, %v1822_v36, 0.0  ;;  %v1027_v18 = vsel %vm252_vm10, %v1823_v29, 0.0  ;;  %v1001_v19 = vadd.f32 %v1000_v42, %v999_v11  ;;  %v1010_v20 = vadd.f32 %v1009_v16, %v1008_v12  ;;  %v1139_v11 = vpop.permute.xlu1 %1138 }
  0xdf   : > { %v1019_v21 = vadd.f32 %v1018_v17, %v1017_v13  ;;  %v1028_v22 = vadd.f32 %v1027_v18, %v1026_v14  ;;  %v308_v23 = vcombine.low %v2244_v34, %v2247_v35  ;;  %v443_v24 = vadd.f32 %v442_v27, %v2251_v46 }
  0xe0   : > { %v452_v25 = vadd.f32 %v451_v41, %v2253_v47  ;;  %v461_v26 = vadd.f32 %v460_v44, %v2255_v48  ;;  %v1002_v50 = vrot.slane %v1001_v19, 4  ;;  %v1011_v55 = vrot.slane %v1010_v20, 4 }
  0xe1   : > { %v1020_v56 = vrot.slane %v1019_v21, 4  ;;  %v1029_v57 = vrot.slane %v1028_v22, 4  ;;  %v818_v58 = vrot.slane %v2336_v7, 1  ;;  %v315_v34 = vrot.slane %v308_v23, %v2223_v6 }
  0xe2   : > { %v470_v35 = vadd.f32 %v469_v45, %v2257_v49  ;;  %v477_v46 = vcombine.low %v443_v24, %v452_v25  ;;  %v1003_v27 = vadd.f32 %v1002_v50, %v1001_v19  ;;  %v1012_v4 = vadd.f32 %v1011_v55, %v1010_v20  ;;  %v1144_v45 = vpop.permute.xlu0 %1143  ;;  %v1149_v25 = vpop.permute.xlu1 %1148 }
  0xe3   : > { %v1021_v47 = vadd.f32 %v1020_v56, %v1019_v21  ;;  %v1030_v41 = vadd.f32 %v1029_v57, %v1028_v22  ;;  %321 = vst.msk [vmem:[#allocation2] sm:$0xf] %vm2332_vm6, %v315_v34  ;;  %vm1151_vm12 = vcmp.lt.f32.partialorder %v1139_v11, %v2144_v37  ;;  %vm1152_vm13 = vcmp.lt.f32.partialorder %v1139_v11, %v2147_v38 }
  0xe4   : > { %v478_v48 = vcombine.low %v461_v26, %v470_v35  ;;  %v485_v44 = vrot.slane %v477_v46, %v2223_v6  ;;  %v1004_v12 = vrot.slane %v1003_v27, 2  ;;  %v1013_v13 = vrot.slane %v1012_v4, 2 }
  0xe5   : > { %v1022_v14 = vrot.slane %v1021_v47, 2  ;;  %v1031_v49 = vrot.slane %v1030_v41, 2  ;;  %v827_v28 = vrot.slane %v2338_v8, 1  ;;  %vm1153_vm14 = vcmp.lt.f32.partialorder %v1139_v11, %v2150_v39 }
  0xe6   : > { %v492_v15 = vrot.slane %v478_v48, %v2223_v6  ;;  %vm1154_vm15 = vcmp.lt.f32.partialorder %v1139_v11, %v2153_v40  ;;  %v836_v36 = vrot.slane %v2340_v9, 1  ;;  %v845_v29 = vrot.slane %v2342_v10, 1 }
  0xe7   : > { %v1824_v42 = vsel %vm1151_vm12, 1.0, %v2014_v43  ;;  %v1825_v16 = vsel %vm1152_vm13, 1.0, %v2014_v43  ;;  %v2385_v17 = vadd.f32 %v1004_v12, %v1003_v27  ;;  %v2387_v18 = vadd.f32 %v1013_v13, %v1012_v4 }
  0xe8   : > { %v493_v19 = vcombine.low %v485_v44, %v492_v15  ;;  %vm1155_vm0 = vcmp.lt.f32.partialorder %v1144_v45, %v2144_v37  ;;  %v2390_v20 = vadd.f32 %v1022_v14, %v1021_v47  ;;  %v2392_v21 = vadd.f32 %v1031_v49, %v1030_v41 }
  0xe9   : > { %v1826_v22 = vsel %vm1153_vm14, 1.0, %v2014_v43  ;;  %v1827_v23 = vsel %vm1154_vm15, 1.0, %v2014_v43  ;;  %vm1156_vm1 = vcmp.lt.f32.partialorder %v1144_v45, %v2147_v38  ;;  %vm1157_vm2 = vcmp.lt.f32.partialorder %v1144_v45, %v2150_v39 }
  0xea   : > { %v500_v24 = vrot.slane %v493_v19, %v2223_v6  ;;  %vm1158_vm3 = vcmp.lt.f32.partialorder %v1144_v45, %v2153_v40  ;;  %v471_v26 = vld [vmem:[#allocation2] sm:$0xf]  ;;  %v1828_v50 = vsel %vm1155_vm0, 1.0, %v2014_v43  ;;  %v1829_v55 = vsel %vm1156_vm1, 1.0, %v2014_v43 }
  0xeb   : > { %v1830_v56 = vsel %vm1157_vm2, 1.0, %v2014_v43  ;;  %v1831_v57 = vsel %vm1158_vm3, 1.0, %v2014_v43  ;;  %v472_v34 = vmul.f32 0.9438743, %v471_v26  ;;  %v1187_v35 = vadd.f32 %v1828_v50, %v1824_v42 }
  0xec   : > { %v1196_v46 = vadd.f32 %v1829_v55, %v1825_v16  ;;  %v1205_v27 = vadd.f32 %v1830_v56, %v1826_v22  ;;  %v1214_v4 = vadd.f32 %v1831_v57, %v1827_v23  ;;  %vm1159_vm4 = vcmp.lt.f32.partialorder %v1149_v25, %v2144_v37 }
  0xed   : > { %vm1160_vm5 = vcmp.lt.f32.partialorder %v1149_v25, %v2147_v38  ;;  %vm1161_vm7 = vcmp.lt.f32.partialorder %v1149_v25, %v2150_v39  ;;  %v2407_v47 = vadd.f32 %v500_v24, %v472_v34  ;;  %vm1162_vm8 = vcmp.lt.f32.partialorder %v1149_v25, %v2153_v40 }
  0xee   : > { %v1832_v41 = vsel %vm1159_vm4, 1.0, %v2014_v43  ;;  %v1833_v11 = vsel %vm1160_vm5, 1.0, %v2014_v43  ;;  %v1834_v48 = vsel %vm1161_vm7, 1.0, %v2014_v43  ;;  %v1835_v44 = vsel %vm1162_vm8, 1.0, %v2014_v43 }
  0xef   : > { %v1188_v12 = vsel %vm252_vm10, %v1832_v41, 0.0  ;;  %v1197_v13 = vsel %vm252_vm10, %v1833_v11, 0.0  ;;  %505 = vrot.lane.b32.xlu1 %v2407_v47, %s2015_s4  ;;  %503 = vst.msk [vmem:[#allocation2] sm:$0xf] %vm2332_vm6, %v2407_v47  ;;  %v1206_v45 = vsel %vm252_vm10, %v1834_v48, 0.0  ;;  %v1215_v15 = vsel %vm252_vm10, %v1835_v44, 0.0  ;;  %v1332_v44 = vpop.permute.xlu0 %1331 }
  0xf0   : > { %v1189_v14 = vadd.f32 %v1188_v12, %v1187_v35  ;;  %v1198_v49 = vadd.f32 %v1197_v13, %v1196_v46  ;;  %v1207_v42 = vadd.f32 %v1206_v45, %v1205_v27  ;;  %v1216_v16 = vadd.f32 %v1215_v15, %v1214_v4 }
  0xf1   : > { %v631_v19 = vadd.f32 %v630_v63, %v2291_v51  ;;  %v640_v22 = vadd.f32 %v639_v1, %v2293_v52  ;;  %v649_v25 = vadd.f32 %v648_v2, %v2295_v53  ;;  %v658_v26 = vadd.f32 %v657_v3, %v2297_v54  ;;  %v1327_v1 = vpop.permute.xlu1 %1326 }
  0xf2   : > { %v1190_v23 = vrot.slane %v1189_v14, 4  ;;  %v1199_v24 = vrot.slane %v1198_v49, 4  ;;  %v1006_v50 = vrot.slane %v2385_v17, 1  ;;  %v1208_v55 = vrot.slane %v1207_v42, 4 }
  0xf3   : > { %v1217_v56 = vrot.slane %v1216_v16, 4  ;;  %v665_v57 = vcombine.low %v631_v19, %v640_v22  ;;  %v1015_v51 = vrot.slane %v2387_v18, 1  ;;  %v666_v52 = vcombine.low %v649_v25, %v658_v26 }
  0xf4   : > { %v1191_v63 = vadd.f32 %v1190_v23, %v1189_v14  ;;  %v1200_v34 = vadd.f32 %v1199_v24, %v1198_v49  ;;  %v1209_v35 = vadd.f32 %v1208_v55, %v1207_v42  ;;  %vm1339_vm9 = vcmp.lt.f32.partialorder %v1327_v1, %v2144_v37 }
  0xf5   : > { %v1218_v46 = vadd.f32 %v1217_v56, %v1216_v16  ;;  %v673_v27 = vrot.slane %v665_v57, %v2223_v6  ;;  %v680_v54 = vrot.slane %v666_v52, %v2223_v6  ;;  %vm1340_vm11 = vcmp.lt.f32.partialorder %v1327_v1, %v2147_v38  ;;  %v1337_v24 = vpop.permute.xlu1 %1336 }
  0xf6   : > { %v1192_v53 = vrot.slane %v1191_v63, 2  ;;  %v1201_v2 = vrot.slane %v1200_v34, 2  ;;  %v1024_v3 = vrot.slane %v2390_v20, 1  ;;  %v1033_v4 = vrot.slane %v2392_v21, 1  ;;  %v659_v48 = vld [vmem:[#allocation2] sm:$0xf] }
  0xf7   : > { %v1210_v41 = vrot.slane %v1209_v35, 2  ;;  %v1219_v11 = vrot.slane %v1218_v46, 2  ;;  %v660_v12 = vmul.f32 0.9438743, %v659_v48  ;;  %v681_v13 = vcombine.low %v673_v27, %v680_v54 }
  0xf8   : > { %vm1341_vm12 = vcmp.lt.f32.partialorder %v1327_v1, %v2150_v39  ;;  %vm1342_vm13 = vcmp.lt.f32.partialorder %v1327_v1, %v2153_v40  ;;  %v2445_v14 = vadd.f32 %v1192_v53, %v1191_v63  ;;  %v2447_v49 = vadd.f32 %v1201_v2, %v1200_v34 }
  0xf9   : > { %v1836_v45 = vsel %vm1339_vm9, 1.0, %v2014_v43  ;;  %v1837_v15 = vsel %vm1340_vm11, 1.0, %v2014_v43  ;;  %v2453_v42 = vadd.f32 %v1210_v41, %v1209_v35  ;;  %v2455_v16 = vadd.f32 %v1219_v11, %v1218_v46 }
  0xfa   : > { %v688_v19 = vrot.slane %v681_v13, %v2223_v6  ;;  %vm1343_vm14 = vcmp.lt.f32.partialorder %v1332_v44, %v2144_v37  ;;  %v1838_v22 = vsel %vm1341_vm12, 1.0, %v2014_v43  ;;  %v1839_v23 = vsel %vm1342_vm13, 1.0, %v2014_v43 }
  0xfb   : > { %vm1344_vm15 = vcmp.lt.f32.partialorder %v1332_v44, %v2147_v38  ;;  %vm1345_vm0 = vcmp.lt.f32.partialorder %v1332_v44, %v2150_v39  ;;  %vm1346_vm1 = vcmp.lt.f32.partialorder %v1332_v44, %v2153_v40  ;;  %v1840_v26 = vsel %vm1343_vm14, 1.0, %v2014_v43 }
  0xfc   : > { %v2463_v25 = vadd.f32 %v688_v19, %v660_v12  ;;  %v1841_v55 = vsel %vm1344_vm15, 1.0, %v2014_v43  ;;  %v1842_v56 = vsel %vm1345_vm0, 1.0, %v2014_v43  ;;  %v1843_v57 = vsel %vm1346_vm1, 1.0, %v2014_v43 }
  0xfd   : > { %v1375_v63 = vadd.f32 %v1840_v26, %v1836_v45  ;;  %v1384_v34 = vadd.f32 %v1841_v55, %v1837_v15  ;;  %v1393_v52 = vadd.f32 %v1842_v56, %v1838_v22  ;;  %v1402_v1 = vadd.f32 %v1843_v57, %v1839_v23 }
  0xfe   : > { %693 = vrot.lane.b32.xlu0 %v2463_v25, %s2015_s4  ;;  %691 = vst.msk [vmem:[#allocation2] sm:$0xf] %vm2332_vm6, %v2463_v25  ;;  %vm1347_vm2 = vcmp.lt.f32.partialorder %v1337_v24, %v2144_v37  ;;  %vm1348_vm3 = vcmp.lt.f32.partialorder %v1337_v24, %v2147_v38  ;;  %vm1349_vm4 = vcmp.lt.f32.partialorder %v1337_v24, %v2150_v39 }
  0xff   : > { %vm1350_vm5 = vcmp.lt.f32.partialorder %v1337_v24, %v2153_v40  ;;  %v1844_v35 = vsel %vm1347_vm2, 1.0, %v2014_v43  ;;  %v1845_v46 = vsel %vm1348_vm3, 1.0, %v2014_v43  ;;  %v1846_v27 = vsel %vm1349_vm4, 1.0, %v2014_v43 }
 0x100   : > { %v1847_v53 = vsel %vm1350_vm5, 1.0, %v2014_v43  ;;  %v1376_v2 = vsel %vm252_vm10, %v1844_v35, 0.0  ;;  %v1385_v54 = vsel %vm252_vm10, %v1845_v46, 0.0  ;;  %v1394_v48 = vsel %vm252_vm10, %v1846_v27, 0.0 }
 0x101   : > { %v1377_v41 = vadd.f32 %v1376_v2, %v1375_v63  ;;  %v1386_v11 = vadd.f32 %v1385_v54, %v1384_v34  ;;  %v1403_v44 = vsel %vm252_vm10, %v1847_v53, 0.0  ;;  %v1395_v12 = vadd.f32 %v1394_v48, %v1393_v52  ;;  %v1515_v54 = vpop.permute.xlu1 %1514 }
 0x102   : > { %v1404_v13 = vadd.f32 %v1403_v44, %v1402_v1  ;;  %v819_v45 = vadd.f32 %v818_v58, %v2336_v7  ;;  %v828_v15 = vadd.f32 %v827_v28, %v2338_v8  ;;  %v837_v23 = vadd.f32 %v836_v36, %v2340_v9 }
 0x103   : > { %v1378_v19 = vrot.slane %v1377_v41, 4  ;;  %v1387_v22 = vrot.slane %v1386_v11, 4  ;;  %v846_v24 = vadd.f32 %v845_v29, %v2342_v10  ;;  %v1396_v26 = vrot.slane %v1395_v12, 4 }
 0x104   : > { %v1405_v55 = vrot.slane %v1404_v13, 4  ;;  %v853_v56 = vcombine.low %v819_v45, %v828_v15  ;;  %v1007_v7 = vadd.f32 %v1006_v50, %v2385_v17  ;;  %v1016_v28 = vadd.f32 %v1015_v51, %v2387_v18 }
 0x105   : > { %v1379_v58 = vadd.f32 %v1378_v19, %v1377_v41  ;;  %v1388_v57 = vadd.f32 %v1387_v22, %v1386_v11  ;;  %v854_v8 = vcombine.low %v837_v23, %v846_v24  ;;  %v1194_v9 = vrot.slane %v2445_v14, 1  ;;  %v847_v34 = vld [vmem:[#allocation2] sm:$0xf] }
 0x106   : > { %v1397_v36 = vadd.f32 %v1396_v26, %v1395_v12  ;;  %v1406_v63 = vadd.f32 %v1405_v55, %v1404_v13  ;;  %v861_v10 = vrot.slane %v853_v56, %v2223_v6  ;;  %v1025_v17 = vadd.f32 %v1024_v3, %v2390_v20  ;;  %v1525_v55 = vpop.permute.xlu1 %1524 }
 0x107   : > { %v1380_v29 = vrot.slane %v1379_v58, 2  ;;  %v1389_v52 = vrot.slane %v1388_v57, 2  ;;  %v868_v1 = vrot.slane %v854_v8, %v2223_v6  ;;  %v1034_v18 = vadd.f32 %v1033_v4, %v2392_v21  ;;  %v1520_v4 = vpop.permute.xlu0 %1519 }
 0x108   : > { %v1398_v50 = vrot.slane %v1397_v36, 2  ;;  %v1407_v35 = vrot.slane %v1406_v63, 2  ;;  %v1041_v51 = vcombine.low %v1007_v7, %v1016_v28  ;;  %v1203_v46 = vrot.slane %v2447_v49, 1 }
 0x109   : > { %v1212_v27 = vrot.slane %v2453_v42, 1  ;;  %v848_v53 = vmul.f32 0.9438743, %v847_v34  ;;  %v869_v2 = vcombine.low %v861_v10, %v868_v1  ;;  %v1221_v41 = vrot.slane %v2455_v16, 1 }
 0x10a   : > { %v1042_v11 = vcombine.low %v1025_v17, %v1034_v18  ;;  %v1049_v48 = vrot.slane %v1041_v51, %v2223_v6  ;;  %vm1527_vm7 = vcmp.lt.f32.partialorder %v1515_v54, %v2144_v37  ;;  %v2519_v20 = vadd.f32 %v1380_v29, %v1379_v58 }
 0x10b   : > { %v2521_v3 = vadd.f32 %v1389_v52, %v1388_v57  ;;  %v876_v21 = vrot.slane %v869_v2, %v2223_v6  ;;  %vm1528_vm8 = vcmp.lt.f32.partialorder %v1515_v54, %v2147_v38  ;;  %v2525_v44 = vadd.f32 %v1398_v50, %v1397_v36 }
 0x10c   : > { %v2527_v12 = vadd.f32 %v1407_v35, %v1406_v63  ;;  %v1056_v13 = vrot.slane %v1042_v11, %v2223_v6  ;;  %vm1529_vm9 = vcmp.lt.f32.partialorder %v1515_v54, %v2150_v39  ;;  %vm1530_vm11 = vcmp.lt.f32.partialorder %v1515_v54, %v2153_v40 }
 0x10d   : > { %v2531_v45 = vadd.f32 %v876_v21, %v848_v53  ;;  %v1848_v15 = vsel %vm1527_vm7, 1.0, %v2014_v43  ;;  %v1849_v19 = vsel %vm1528_vm8, 1.0, %v2014_v43  ;;  %v1850_v23 = vsel %vm1529_vm9, 1.0, %v2014_v43 }
 0x10e   : > { %v1057_v22 = vcombine.low %v1049_v48, %v1056_v13  ;;  %v1851_v24 = vsel %vm1530_vm11, 1.0, %v2014_v43  ;;  %vm1531_vm12 = vcmp.lt.f32.partialorder %v1520_v4, %v2144_v37  ;;  %vm1532_vm13 = vcmp.lt.f32.partialorder %v1520_v4, %v2147_v38 }
 0x10f   : > { %881 = vrot.lane.b32.xlu1 %v2531_v45, %s2015_s4  ;;  %879 = vst.msk [vmem:[#allocation2] sm:$0xf] %vm2332_vm6, %v2531_v45  ;;  %vm1533_vm14 = vcmp.lt.f32.partialorder %v1520_v4, %v2150_v39  ;;  %vm1534_vm15 = vcmp.lt.f32.partialorder %v1520_v4, %v2153_v40  ;;  %v1852_v26 = vsel %vm1531_vm12, 1.0, %v2014_v43  ;;  %v1853_v7 = vsel %vm1532_vm13, 1.0, %v2014_v43 }
 0x110   : > { %v1064_v56 = vrot.slane %v1057_v22, %v2223_v6  ;;  %v1854_v58 = vsel %vm1533_vm14, 1.0, %v2014_v43  ;;  %v1855_v57 = vsel %vm1534_vm15, 1.0, %v2014_v43  ;;  %v1563_v8 = vadd.f32 %v1852_v26, %v1848_v15 }
 0x111   : > { %v1572_v28 = vadd.f32 %v1853_v7, %v1849_v19  ;;  %v1581_v36 = vadd.f32 %v1854_v58, %v1850_v23  ;;  %v1590_v63 = vadd.f32 %v1855_v57, %v1851_v24  ;;  %vm1535_vm0 = vcmp.lt.f32.partialorder %v1525_v55, %v2144_v37 }
 0x112   : > { %vm1536_vm1 = vcmp.lt.f32.partialorder %v1525_v55, %v2147_v38  ;;  %vm1537_vm2 = vcmp.lt.f32.partialorder %v1525_v55, %v2150_v39  ;;  %vm1538_vm3 = vcmp.lt.f32.partialorder %v1525_v55, %v2153_v40  ;;  %v1856_v34 = vsel %vm1535_vm0, 1.0, %v2014_v43 }
 0x113   : > { %v1857_v10 = vsel %vm1536_vm1, 1.0, %v2014_v43  ;;  %v1858_v29 = vsel %vm1537_vm2, 1.0, %v2014_v43  ;;  %v1859_v52 = vsel %vm1538_vm3, 1.0, %v2014_v43  ;;  %v1564_v1 = vsel %vm252_vm10, %v1856_v34, 0.0 }
 0x114   : > { %v1573_v17 = vsel %vm252_vm10, %v1857_v10, 0.0  ;;  %v1582_v37 = vsel %vm252_vm10, %v1858_v29, 0.0  ;;  %v1591_v38 = vsel %vm252_vm10, %v1859_v52, 0.0  ;;  %v1565_v50 = vadd.f32 %v1564_v1, %v1563_v8 }
 0x115   : > { %v1574_v39 = vadd.f32 %v1573_v17, %v1572_v28  ;;  %v1583_v35 = vadd.f32 %v1582_v37, %v1581_v36  ;;  %v1592_v40 = vadd.f32 %v1591_v38, %v1590_v63  ;;  %v1195_v51 = vadd.f32 %v1194_v9, %v2445_v14 }
 0x116   : > { %v1035_v18 = vld [vmem:[#allocation2] sm:$0xf]  ;;  %v1204_v53 = vadd.f32 %v1203_v46, %v2447_v49  ;;  %v1213_v43 = vadd.f32 %v1212_v27, %v2453_v42  ;;  %v1222_v2 = vadd.f32 %v1221_v41, %v2455_v16  ;;  %v1566_v11 = vrot.slane %v1565_v50, 4 }
 0x117   : > { %v1036_v54 = vmul.f32 0.9438743, %v1035_v18  ;;  %v1575_v48 = vrot.slane %v1574_v39, 4  ;;  %v1584_v21 = vrot.slane %v1583_v35, 4  ;;  %v1593_v4 = vrot.slane %v1592_v40, 4 }
 0x118   : > { %v1229_v13 = vcombine.low %v1195_v51, %v1204_v53  ;;  %v1230_v15 = vcombine.low %v1213_v43, %v1222_v2  ;;  %v1567_v22 = vadd.f32 %v1566_v11, %v1565_v50  ;;  %v1382_v14 = vrot.slane %v2519_v20, 1 }
 0x119   : > { %v2570_v19 = vadd.f32 %v1064_v56, %v1036_v54  ;;  %v1576_v23 = vadd.f32 %v1575_v48, %v1574_v39  ;;  %v1585_v24 = vadd.f32 %v1584_v21, %v1583_v35  ;;  %v1391_v49 = vrot.slane %v2521_v3, 1 }
 0x11a   : > { %v1594_v9 = vadd.f32 %v1593_v4, %v1592_v40  ;;  %v1400_v42 = vrot.slane %v2525_v44, 1  ;;  %v1409_v16 = vrot.slane %v2527_v12, 1  ;;  %v1237_v46 = vrot.slane %v1229_v13, %v2223_v6 }
 0x11b   : > { %1069 = vrot.lane.b32.xlu0 %v2570_v19, %s2015_s4  ;;  %1067 = vst.msk [vmem:[#allocation2] sm:$0xf] %vm2332_vm6, %v2570_v19  ;;  %v1244_v27 = vrot.slane %v1230_v15, %v2223_v6  ;;  %v1568_v41 = vrot.slane %v1567_v22, 2  ;;  %v1577_v26 = vrot.slane %v1576_v23, 2  ;;  %v1586_v55 = vrot.slane %v1585_v24, 2 }
 0x11c   : > { %v1595_v56 = vrot.slane %v1594_v9, 2  ;;  %v1383_v7 = vadd.f32 %v1382_v14, %v2519_v20  ;;  %v2016_v58 = vmov 15   ;;  %v1392_v8 = vadd.f32 %v1391_v49, %v2521_v3 }
 0x11d   : > { %1938 = vset.pattern.permute.xlu0 %v2016_v58  ;;  %v1245_v57 = vcombine.low %v1237_v46, %v1244_v27  ;;  %v1401_v28 = vadd.f32 %v1400_v42, %v2525_v44  ;;  %v1410_v36 = vadd.f32 %v1409_v16, %v2527_v12  ;;  %v1569_v63 = vadd.f32 %v1568_v41, %v1567_v22 }
 0x11e   : > { %v1578_v34 = vadd.f32 %v1577_v26, %v1576_v23  ;;  %v1587_v10 = vadd.f32 %v1586_v55, %v1585_v24  ;;  %v1596_v29 = vadd.f32 %v1595_v56, %v1594_v9  ;;  %v1417_v37 = vcombine.low %v1383_v7, %v1392_v8 }
 0x11f   : > { %v1252_v17 = vrot.slane %v1245_v57, %v2223_v6  ;;  %v1418_v38 = vcombine.low %v1401_v28, %v1410_v36  ;;  %v1570_v20 = vrot.slane %v1569_v63, 1  ;;  %v322_v22 = vmul.f32 0.95, %v2214_v62 }
 0x120   : > { %v1579_v50 = vrot.slane %v1578_v34, 1  ;;  %v1588_v39 = vrot.slane %v1587_v10, 1  ;;  %v1597_v35 = vrot.slane %v1596_v29, 1  ;;  %v1425_v3 = vrot.slane %v1417_v37, %v2223_v6 }
 0x121   : > { %v1432_v44 = vrot.slane %v1418_v38, %v2223_v6  ;;  %v1571_v12 = vadd.f32 %v1570_v20, %v1569_v63  ;;  %vm357_vm10 = vcmask 1040384   ;;  %vm367_vm14 = vcmp.gt.f32.partialorder %v2214_v62, 0.0 }
 0x122   : > { %v1223_v52 = vld [vmem:[#allocation2] sm:$0xf]  ;;  %v1580_v18 = vadd.f32 %v1579_v50, %v1578_v34  ;;  %v1589_v51 = vadd.f32 %v1588_v39, %v1587_v10  ;;  %v1598_v53 = vadd.f32 %v1597_v35, %v1596_v29  ;;  %v2650_v34 = vld [vmem:[%s2840_s2] sm:$0xf] }
 0x123   : > { %v1224_v1 = vmul.f32 0.9438743, %v1223_v52  ;;  %v1433_v43 = vcombine.low %v1425_v3, %v1432_v44  ;;  %v336_v10 = vrot.slane %v2650_v34, %v2127_v30  ;;  %v340_v29 = vrot.slane %v2650_v34, %v2130_v31 }
 0x124   : > { %v1605_v2 = vcombine.low %v1571_v12, %v1580_v18  ;;  %v1606_v54 = vcombine.low %v1589_v51, %v1598_v53  ;;  %v344_v52 = vrot.slane %v2650_v34, %v2133_v32 }
 0x125   : > { %v2588_v40 = vadd.f32 %v1252_v17, %v1224_v1  ;;  %v1440_v21 = vrot.slane %v1433_v43, %v2223_v6  ;;  %v348_v1 = vrot.slane %v2650_v34, %v2136_v33 }
 0x126   : > { %v1613_v13 = vrot.slane %v1605_v2, %v2223_v6  ;;  %v1620_v15 = vrot.slane %v1606_v54, %v2223_v6 }
 0x127   : > { %1257 = vrot.lane.b32.xlu1 %v2588_v40, %s2015_s4  ;;  %1255 = vst.msk [vmem:[#allocation2] sm:$0xf] %vm2332_vm6, %v2588_v40 }
 0x128   : > { %v1621_v23 = vcombine.low %v1613_v13, %v1620_v15 }
 0x12a   : > { %v1628_v24 = vrot.slane %v1621_v23, %v2223_v6 }
 0x12e   : > { %v1411_v11 = vld [vmem:[#allocation2] sm:$0xf] }
 0x12f   : > { %v1412_v48 = vmul.f32 0.9438743, %v1411_v11 }
 0x131   : > { %v2598_v4 = vadd.f32 %v1440_v21, %v1412_v48 }
 0x133   : > { %1445 = vrot.lane.b32.xlu0 %v2598_v4, %s2015_s4  ;;  %1443 = vst.msk [vmem:[#allocation2] sm:$0xf] %vm2332_vm6, %v2598_v4 }
 0x137   : > { %325 = vperm.xlu0 %1938, %v322_v22  }
 0x13a   : > { %v1599_v14 = vld [vmem:[#allocation2] sm:$0xf] }
 0x13b   : > { %v1600_v49 = vmul.f32 0.9438743, %v1599_v14  ;;  %1939 = vset.pattern.permute.xlu0 %v2005_v0 }
 0x13d   : > { %v2610_v9 = vadd.f32 %v1628_v24, %v1600_v49 }
 0x13f   : > { %1633 = vrot.lane.b32.xlu1 %v2610_v9, %s2015_s4  ;;  %1631 = vst.msk [vmem:[#allocation2] sm:$0xf] %vm2332_vm6, %v2610_v9 }
 0x161   : > { %v2617_v42 = vpop.permute.xlu1 %505 }
 0x162   : > { %v507_v16 = vrot.slane %v2617_v42, 3 }
 0x164   : > { %v509_v6 = vmul.f32 0.95, %v507_v16  ;;  %vm551_vm1 = vcmp.gt.f32.partialorder %v507_v16, 0.0 }
 0x166   : > { %512 = vperm.xlu0 %1939, %v509_v6  }
 0x170   : > { %v2622_v46 = vpop.permute.xlu0 %693 }
 0x171   : > { %v695_v0 = vrot.slane %v2622_v46, 3 }
 0x173   : > { %v697_v27 = vmul.f32 0.95, %v695_v0  ;;  %vm739_vm2 = vcmp.gt.f32.partialorder %v695_v0, 0.0 }
 0x175   : > { %700 = vperm.xlu0 %1939, %v697_v27  }
 0x181   : > { %v2627_v41 = vpop.permute.xlu1 %881 }
 0x182   : > { %v883_v5 = vrot.slane %v2627_v41, 3 }
 0x184   : > { %v885_v26 = vmul.f32 0.95, %v883_v5 }
 0x186   : > { %888 = vperm.xlu0 %1939, %v885_v26  }
 0x18d   : > { %v2632_v55 = vpop.permute.xlu0 %1069 }
 0x18e   : > { %v1071_v56 = vrot.slane %v2632_v55, 3 }
 0x190   : > { %v1073_v7 = vmul.f32 0.95, %v1071_v56  ;;  %vm1115_vm3 = vcmp.gt.f32.partialorder %v1071_v56, 0.0 }
 0x192   : > { %1076 = vperm.xlu0 %1939, %v1073_v7  }
 0x199   : > { %v2637_v58 = vpop.permute.xlu1 %1257 }
 0x19a   : > { %v1259_v57 = vrot.slane %v2637_v58, 3 }
 0x19c   : > { %v1261_v8 = vmul.f32 0.95, %v1259_v57 }
 0x19e   : > { %1264 = vperm.xlu0 %1939, %v1261_v8  }
 0x1a5   : > { %v2642_v28 = vpop.permute.xlu0 %1445 }
 0x1a6   : > { %v1447_v36 = vrot.slane %v2642_v28, 3 }
 0x1a8   : > { %v1449_v63 = vmul.f32 0.95, %v1447_v36 }
 0x1aa   : > { %1452 = vperm.xlu0 %1939, %v1449_v63  }
 0x1b6   : > { %v326_v17 = vpop.permute.xlu0 %325 }
 0x1b7   : > { %vm328_vm6 = vcmp.ge.f32.partialorder %v2208_v59, %v326_v17  ;;  %vm329_vm4 = vcmp.ge.f32.partialorder %v2210_v60, %v326_v17  ;;  %vm330_vm5 = vcmp.ge.f32.partialorder %v2212_v61, %v326_v17  ;;  %vm331_vm7 = vcmp.ge.f32.partialorder %v2214_v62, %v326_v17  ;;  %v2668_v60 = vpop.permute.xlu1 %1633 }
 0x1b8   : > { %v353_v37 = vsel %vm328_vm6, %v336_v10, 3e+38  ;;  %v354_v38 = vsel %vm329_vm4, %v340_v29, 3e+38  ;;  %v355_v20 = vsel %vm330_vm5, %v344_v52, 3e+38 }
 0x1b9   : > { %v356_v50 = vsel %vm331_vm7, %v348_v1, 3e+38  ;;  %v358_v39 = vsel %vm357_vm10, %v353_v37, inf  ;;  %v359_v35 = vsel %vm357_vm10, %v354_v38, inf  ;;  %v360_v3 = vsel %vm357_vm10, %v355_v20, inf }
 0x1ba   : > { %v361_v44 = vsel %vm357_vm10, %v356_v50, inf  ;;  %v362_v12 = vmin.f32 %v358_v39, %v359_v35  ;;  %v1635_v61 = vrot.slane %v2668_v60, 3  ;;  %vm561_vm6 = vcmask 8200  }
 0x1bb   : > { %v363_v59 = vmin.f32 %v360_v3, %v361_v44  ;;  %vm927_vm4 = vcmp.gt.f32.partialorder %v883_v5, 0.0  ;;  %vm1303_vm5 = vcmp.gt.f32.partialorder %v1259_v57, 0.0  ;;  %vm1491_vm7 = vcmp.gt.f32.partialorder %v1447_v36, 0.0 }
 0x1bc   : > { %v1637_v51 = vmul.f32 0.95, %v1635_v61 }
 0x1bd   : > { %v364_v18 = vmin.f32 %v362_v12, %v363_v59 }
 0x1bf   : > { %365 = vmin.xlane.f32.xlu1 %v364_v18 }
 0x1d0   : > { %1640 = vperm.xlu1 %1940, %v1637_v51  }
 0x1e5   : > { %v513_v53 = vpop.permute.xlu0 %512 }
 0x1e6   : > { %v518_v43 = vrot.slane %v513_v53, %v2127_v30 }
 0x1e8   : > { %vm519_vm8 = vcmp.ge.f32.partialorder %v2407_v47, %v518_v43 }
 0x1e9   : > { %v520_v2 = vsel %vm519_vm8, %v2650_v34, 3e+38  ;;  %vm749_vm8 = vcmask 16400  }
 0x1ea   : > { %v525_v54 = vrot.slane %v520_v2, %v2127_v30  ;;  %v529_v11 = vrot.slane %v520_v2, %v2130_v31  ;;  %v533_v48 = vrot.slane %v520_v2, %v2133_v32  ;;  %v537_v21 = vrot.slane %v520_v2, %v2136_v33 }
 0x1ec   : > { %v542_v13 = vsel %vm357_vm10, %v525_v54, inf  ;;  %v543_v15 = vsel %vm357_vm10, %v529_v11, inf  ;;  %v544_v22 = vsel %vm357_vm10, %v533_v48, inf  ;;  %v545_v23 = vsel %vm357_vm10, %v537_v21, inf }
 0x1ed   : > { %v546_v24 = vmin.f32 %v542_v13, %v543_v15  ;;  %v547_v47 = vmin.f32 %v544_v22, %v545_v23 }
 0x1ef   : > { %v548_v14 = vmin.f32 %v546_v24, %v547_v47 }
 0x1f1   : > { %549 = vmin.xlane.f32.xlu0 %v548_v14 }
 0x1f4   : > { %v701_v49 = vpop.permute.xlu0 %700 }
 0x1f5   : > { %v706_v6 = vrot.slane %v701_v49, %v2127_v30 }
 0x1f7   : > { %vm707_vm9 = vcmp.ge.f32.partialorder %v2463_v25, %v706_v6 }
 0x1f8   : > { %v708_v27 = vsel %vm707_vm9, %v2650_v34, 3e+38  ;;  %vm1679_vm9 = vcmp.gt.f32.partialorder %v1635_v61, 0.0 }
 0x1f9   : > { %v713_v26 = vrot.slane %v708_v27, %v2127_v30  ;;  %v717_v7 = vrot.slane %v708_v27, %v2130_v31  ;;  %v721_v8 = vrot.slane %v708_v27, %v2133_v32  ;;  %v725_v63 = vrot.slane %v708_v27, %v2136_v33 }
 0x1fb   : > { %v730_v10 = vsel %vm357_vm10, %v713_v26, inf  ;;  %v731_v29 = vsel %vm357_vm10, %v717_v7, inf  ;;  %v732_v52 = vsel %vm357_vm10, %v721_v8, inf  ;;  %v733_v1 = vsel %vm357_vm10, %v725_v63, inf }
 0x1fc   : > { %v734_v17 = vmin.f32 %v730_v10, %v731_v29  ;;  %v735_v25 = vmin.f32 %v732_v52, %v733_v1 }
 0x1fe   : > { %v736_v37 = vmin.f32 %v734_v17, %v735_v25 }
 0x200   : > { %737 = vmin.xlane.f32.xlu1 %v736_v37 }
 0x205   : > { %v2695_v38 = vpop.permute.xlu0 %888 }
 0x206   : > { %v894_v62 = vrot.slane %v2695_v38, %v2127_v30 }
 0x208   : > { %vm895_vm0 = vcmp.ge.f32.partialorder %v2531_v45, %v894_v62 }
 0x211   : > { %v1077_v20 = vpop.permute.xlu0 %1076 }
 0x212   : > { %v1082_v50 = vrot.slane %v1077_v20, %v2127_v30 }
 0x214   : > { %vm1083_vm11 = vcmp.ge.f32.partialorder %v2570_v19, %v1082_v50 }
 0x215   : > { %v1084_v39 = vsel %vm1083_vm11, %v2650_v34, 3e+38  ;;  %vm937_vm11 = vcmask 24600  }
 0x216   : > { %v1089_v35 = vrot.slane %v1084_v39, %v2127_v30  ;;  %v1093_v3 = vrot.slane %v1084_v39, %v2130_v31  ;;  %v1097_v44 = vrot.slane %v1084_v39, %v2133_v32  ;;  %v1101_v12 = vrot.slane %v1084_v39, %v2136_v33 }
 0x218   : > { %v1106_v59 = vsel %vm357_vm10, %v1089_v35, inf  ;;  %v1107_v18 = vsel %vm357_vm10, %v1093_v3, inf  ;;  %v1108_v51 = vsel %vm357_vm10, %v1097_v44, inf  ;;  %v1109_v53 = vsel %vm357_vm10, %v1101_v12, inf }
 0x219   : > { %v1110_v43 = vmin.f32 %v1106_v59, %v1107_v18  ;;  %v1111_v19 = vmin.f32 %v1108_v51, %v1109_v53 }
 0x21b   : > { %v1112_v2 = vmin.f32 %v1110_v43, %v1111_v19 }
 0x21d   : > { %1113 = vmin.xlane.f32.xlu1 %v1112_v2  ;;  %v1265_v54 = vpop.permute.xlu0 %1264 }
 0x21e   : > { %v1270_v11 = vrot.slane %v1265_v54, %v2127_v30 }
 0x220   : > { %vm1271_vm12 = vcmp.ge.f32.partialorder %v2588_v40, %v1270_v11 }
 0x221   : > { %v1272_v48 = vsel %vm1271_vm12, %v2650_v34, 3e+38  ;;  %vm1125_vm12 = vcmask 32800  }
 0x222   : > { %v1277_v21 = vrot.slane %v1272_v48, %v2127_v30  ;;  %v1281_v13 = vrot.slane %v1272_v48, %v2130_v31  ;;  %v1285_v15 = vrot.slane %v1272_v48, %v2133_v32  ;;  %v1289_v22 = vrot.slane %v1272_v48, %v2136_v33 }
 0x223   : > { %v896_v48 = vsel %vm895_vm0, %v2650_v34, 3e+38 }
 0x224   : > { %v1294_v23 = vsel %vm357_vm10, %v1277_v21, inf  ;;  %v1295_v24 = vsel %vm357_vm10, %v1281_v13, inf  ;;  %v1296_v47 = vsel %vm357_vm10, %v1285_v15, inf  ;;  %v1297_v14 = vsel %vm357_vm10, %v1289_v22, inf }
 0x225   : > { %v1298_v49 = vmin.f32 %v1294_v23, %v1295_v24  ;;  %v1299_v40 = vmin.f32 %v1296_v47, %v1297_v14  ;;  %v901_v21 = vrot.slane %v896_v48, %v2127_v30  ;;  %v905_v38 = vrot.slane %v896_v48, %v2130_v31 }
 0x226   : > { %v909_v13 = vrot.slane %v896_v48, %v2133_v32  ;;  %v913_v15 = vrot.slane %v896_v48, %v2136_v33 }
 0x227   : > { %v1300_v6 = vmin.f32 %v1298_v49, %v1299_v40  ;;  %v918_v22 = vsel %vm357_vm10, %v901_v21, inf  ;;  %v919_v23 = vsel %vm357_vm10, %v905_v38, inf }
 0x228   : > { %v920_v24 = vsel %vm357_vm10, %v909_v13, inf  ;;  %v921_v45 = vsel %vm357_vm10, %v913_v15, inf  ;;  %v922_v47 = vmin.f32 %v918_v22, %v919_v23 }
 0x229   : > { %1301 = vmin.xlane.f32.xlu1 %v1300_v6  ;;  %v1453_v27 = vpop.permute.xlu0 %1452  ;;  %v923_v14 = vmin.f32 %v920_v24, %v921_v45 }
 0x22a   : > { %v1458_v26 = vrot.slane %v1453_v27, %v2127_v30 }
 0x22b   : > { %v924_v49 = vmin.f32 %v922_v47, %v923_v14 }
 0x22c   : > { %vm1459_vm13 = vcmp.ge.f32.partialorder %v2598_v4, %v1458_v26 }
 0x22d   : > { %v1460_v7 = vsel %vm1459_vm13, %v2650_v34, 3e+38  ;;  %vm1313_vm13 = vcmask 41000  }
 0x22e   : > { %v1465_v8 = vrot.slane %v1460_v7, %v2127_v30  ;;  %v1469_v63 = vrot.slane %v1460_v7, %v2130_v31  ;;  %v1473_v10 = vrot.slane %v1460_v7, %v2133_v32  ;;  %v1477_v29 = vrot.slane %v1460_v7, %v2136_v33 }
 0x230   : > { %v1482_v52 = vsel %vm357_vm10, %v1465_v8, inf  ;;  %v1483_v1 = vsel %vm357_vm10, %v1469_v63, inf  ;;  %v1484_v17 = vsel %vm357_vm10, %v1473_v10, inf  ;;  %v1485_v25 = vsel %vm357_vm10, %v1477_v29, inf }
 0x231   : > { %v1486_v37 = vmin.f32 %v1482_v52, %v1483_v1  ;;  %v1487_v4 = vmin.f32 %v1484_v17, %v1485_v25 }
 0x233   : > { %v1488_v20 = vmin.f32 %v1486_v37, %v1487_v4 }
 0x235   : > { %1489 = vmin.xlane.f32.xlu1 %v1488_v20 }
 0x24c   : > { %v366_v50 = vpop.xlane.xlu1 %365 }
 0x24d   : > { %v368_v39 = vsel %vm367_vm14, %v366_v50, 0.35  ;;  %vm1501_vm14 = vcmask 49200  }
 0x24e   : > { %370 = vrot.lane.b32.xlu0 %v368_v39, %s2015_s4  ;;  %s1941_s4 = scalar_lea.vmem %s2795_s26, 16 }
 0x24f   : > { %p1942_p11 = scmp.ne.s32.totalorder %s2795_s26, %s1941_s4  ;;  %p1949_p1 = scmp.lt.s32.totalorder %s1947_s6, %s1941_s4 }
 0x250   : > { %v1641_v35 = vpop.permute.xlu1 %1640 }
 0x251   : > { %v1646_v3 = vrot.slane %v1641_v35, %v2127_v30  ;;  %p1943_p12 = pnand %p1942_p11, %p2083_p5  ;;  %p1950_p2 = por %p1949_p1, %p1948_p0 }
 0x253   : > { %vm1647_vm15 = vcmp.ge.f32.partialorder %v2610_v9, %v1646_v3  ;;  %p1944_p13 = pneg %p1943_p12 }
 0x254   : > { %v1648_v44 = vsel %vm1647_vm15, %v2650_v34, 3e+38  ;;  %vm1689_vm15 = vcmask 57400  }
 0x255   : > { %v1653_v12 = vrot.slane %v1648_v44, %v2127_v30  ;;  %v1657_v59 = vrot.slane %v1648_v44, %v2130_v31  ;;  %v1661_v18 = vrot.slane %v1648_v44, %v2133_v32  ;;  %v1665_v51 = vrot.slane %v1648_v44, %v2136_v33  ;;  %p1951_p3 = pnand %p1950_p2, %p1944_p13 }
 0x257   : > { %v1670_v53 = vsel %vm357_vm10, %v1653_v12, inf  ;;  %v1671_v43 = vsel %vm357_vm10, %v1657_v59, inf  ;;  %v1672_v19 = vsel %vm357_vm10, %v1661_v18, inf  ;;  %v1673_v9 = vsel %vm357_vm10, %v1665_v51, inf }
 0x258   : > { %v1674_v2 = vmin.f32 %v1670_v53, %v1671_v43  ;;  %v1675_v54 = vmin.f32 %v1672_v19, %v1673_v9  ;;  %vm373_vm10 = vcmask 0  }
 0x25a   : > { %v1676_v11 = vmin.f32 %v1674_v2, %v1675_v54 }
 0x25c   : > { %1677 = vmin.xlane.f32.xlu1 %v1676_v11 }
 0x26d   : > { %925 = vmin.xlane.f32.xlu0 %v924_v49 }
 0x27e   : > { %v550_v31 = vpop.xlane.xlu0 %549 }
 0x27f   : > { %v552_v34 = vsel %vm551_vm1, %v550_v31, 0.35 }
 0x280   : > { %v557_v32 = vrot.slane %v552_v34, %v2127_v30 }
 0x282   : > { %558 = vrot.lane.b32.xlu1 %v557_v32, %s2017_s7 }
 0x28d   : > { %v738_v33 = vpop.xlane.xlu1 %737 }
 0x28e   : > { %v740_v40 = vsel %vm739_vm2, %v738_v33, 0.35 }
 0x28f   : > { %v745_v6 = vrot.slane %v740_v40, %v2127_v30 }
 0x291   : > { %746 = vrot.lane.b32.xlu0 %v745_v6, %s2018_s8 }
 0x2aa   : > { %v1114_v42 = vpop.xlane.xlu1 %1113 }
 0x2ab   : > { %v1116_v16 = vsel %vm1115_vm3, %v1114_v42, 0.35 }
 0x2ac   : > { %v1121_v27 = vrot.slane %v1116_v16, %v2127_v30 }
 0x2ae   : > { %1122 = vrot.lane.b32.xlu0 %v1121_v27, %s2019_s9 }
 0x2b6   : > { %v1302_v0 = vpop.xlane.xlu1 %1301 }
 0x2b7   : > { %v1304_v10 = vsel %vm1303_vm5, %v1302_v0, 0.35 }
 0x2b8   : > { %v1309_v29 = vrot.slane %v1304_v10, %v2127_v30 }
 0x2c0   : > { %v371_v46 = vpop.permute.xlu0 %370 }
 0x2c1   : > { %374 = vst.msk [vmem:[%s2767_s11] sm:$0x1] %vm373_vm10, %v371_v46 }
 0x2c2   : > { %v1490_v26 = vpop.xlane.xlu1 %1489 }
 0x2c3   : > { %v1492_v52 = vsel %vm1491_vm7, %v1490_v26, 0.35 }
 0x2c4   : > { %v1497_v5 = vrot.slane %v1492_v52, %v2127_v30 }
 0x2e9   : > { %v1678_v7 = vpop.xlane.xlu1 %1677 }
 0x2ea   : > { %v1680_v58 = vsel %vm1679_vm9, %v1678_v7, 0.35 }
 0x2eb   : > { %v1685_v57 = vrot.slane %v1680_v58, %v2127_v30 }
 0x2f4   : > { %v559_v55 = vpop.permute.xlu1 %558 }
 0x2f5   : > { %562 = vst.msk [vmem:[%s2767_s11] sm:$0x1] %vm561_vm6, %v559_v55 }
 0x2fa   : > { %v926_v56 = vpop.xlane.xlu0 %925 }
 0x2fb   : > { %v928_v8 = vsel %vm927_vm4, %v926_v56, 0.35 }
 0x2fc   : > { %v933_v63 = vrot.slane %v928_v8, %v2127_v30 }
 0x2fe   : > { %934 = vrot.lane.b32.xlu1 %v933_v63, %s2020_s17 }
 0x302   : > { %1310 = vrot.lane.b32.xlu1 %v1309_v29, %s2021_s19 }
 0x303   : > { %v747_v41 = vpop.permute.xlu0 %746 }
 0x304   : > { %750 = vst.msk [vmem:[%s2767_s11] sm:$0x1] %vm749_vm8, %v747_v41 }
 0x306   : > { %1498 = vrot.lane.b32.xlu1 %v1497_v5, %s2022_s20 }
 0x30a   : > { %1686 = vrot.lane.b32.xlu1 %v1685_v57, %s2023_s24 }
 0x320   : > { %v1123_v36 = vpop.permute.xlu0 %1122 }
 0x370   : > { %v935_v28 = vpop.permute.xlu1 %934 }
 0x371   : > { %938 = vst.msk [vmem:[%s2767_s11] sm:$0x1] %vm937_vm11, %v935_v28 }
 0x372   : > { %1126 = vst.msk [vmem:[%s2767_s11] sm:$0x1] %vm1125_vm12, %v1123_v36 }
 0x374   : > { %v1311_v60 = vpop.permute.xlu1 %1310 }
 0x375   : > { %1314 = vst.msk [vmem:[%s2767_s11] sm:$0x1] %vm1313_vm13, %v1311_v60 }
 0x378   : > { %v1499_v61 = vpop.permute.xlu1 %1498 }
 0x379   : > { %1502 = vst.msk [vmem:[%s2767_s11] sm:$0x1] %vm1501_vm14, %v1499_v61 }
 0x37c   : > { %v1687_v30 = vpop.permute.xlu1 %1686 }
 0x37d   : > { %1690 = vst.msk [vmem:[%s2767_s11] sm:$0x1] %vm1689_vm15, %v1687_v30 }
 0x37e   : > { %1954 = shalt.err (!%p1951_p3)
}
 0x37f   : > { %s1955_s7 = scalar_lea.hbm %s2793_s29, 16  ;;  %s1959_s10 = scalar_lea.hbm %s2841_s3, 32 }
 0x380   : > { %p1956_p4 = scmp.ne.s32.totalorder %s2793_s29, %s1955_s7  ;;  %p1960_p9 = scmp.lt.u32.totalorder %s2793_s29, %s2841_s3 }
 0x381   : > { %p1961_p10 = scmp.lt.u32.totalorder %s1959_s10, %s1955_s7  ;;  %p1963_p12 = scmp.lt.u32.totalorder %s1955_s7, %s2793_s29 }
 0x382   : > { %p1957_p7 = pnand %p1956_p4, %p2083_p5 }
 0x383   : > { %p1962_p11 = por %p1961_p10, %p1960_p9 }
 0x384   : > { %p1958_p8 = pneg %p1957_p7 }
 0x385   : > { %p1964_p13 = por %p1963_p12, %p1962_p11 }
 0x387   : > { %p1965_p0 = pnand %p1964_p13, %p1958_p8 }
 0x389   : > { %1968 = shalt.err (!%p1965_p0)
}
 0x38a   : > { %1864 = dma.vmem_to_hbm [thread:$0]  (%p2083_p5), %s2795_s26, 16, %s2793_s29, %s1692_s30  }
 0x38b PF: > { %p1870_p1 = scmp.ge.s32.totalorder %s2003_s15, 2  ;;  %s1716_s19 = sand.u32 1, %s1991_s12  }
 0x38c   : > { %s1717_s20 = scalar_lea.sflag [#allocation4], %s1716_s19 }
 0x38d   : > { %p1867_p2 = pnand %p1870_p1, %p2087_p6 }
 0x38f   : > { %1986 = dma.done.wait (!%p1867_p2), %s1717_s20, 16  }
 0x390   : > { %1988 = vsyncadd (!%p1867_p2), %s1717_s20, 4294967280  ;;  %p13_p3 = scmp.ge.s32.totalorder %s2070_s18, 4   ;;  %s2846_s12 = smov %s1995_s13 }
 0x391   : > { %s2847_s13 = smov %s1999_s14  ;;  %s2848_s14 = smov %s2081_s21 }
 0x392   : > { %s2849_s15 = smov %s2070_s18  ;;  %15 = sbr.rel (!%p13_p3) target bundleno = 3 (0x3), region = 67 }
 0x399   :  { %1721 = vsyncpa [#allocation4], 1 }
 0x39a   :  { %1723 = vsyncpa [#allocation4 + $0x1], 1 }

</bundles_post_ra>
